<compile_context>
chip_gen: v7x
topology: tpu7x:2x2x1
jax: 0.10.0
libtpu: 0.0.40
codegen_flags: <defaults>
</compile_context>

<pallas_src>
import jax
import jax.numpy as jnp
from jax import lax
from jax.experimental import pallas as pl
from jax.experimental.pallas import tpu as pltpu

EPS = 1e-5


# ---------------------------------------------------------------- kernels ---

def _make_conv_kernel(pool, bn_in, hp, wp, cin, cout):
    """Fused [2x2 maxpool | BN+ReLU] -> im2col -> single 3x3-conv matmul -> stats.

    Ref order: x, w, [scale, shift,] y, sum, sumsq, pad_scratch.
    y is stored CHW-flat (cout, hp*wp) bf16 so its trailing dim is lane-dense
    and the final output is already NCHW-ordered.
    """

    def kernel(*refs):
        if bn_in:
            x_ref, w_ref, scale_ref, shift_ref, y_ref, s_ref, q_ref, pad_ref = refs
        else:
            x_ref, w_ref, y_ref, s_ref, q_ref, pad_ref = refs

        # ---- input read path -> (hp, wp, cin) f32 --------------------------
        if pool:
            # x: (hp, 2, wp, 2*cin). axis 1 is the vertical 2x2 partner,
            # the lane halves [:cin]/[cin:] are the horizontal partner.
            x = x_ref[0].astype(jnp.float32)
            x = jnp.maximum(x[:, 0], x[:, 1])                    # (hp, wp, 2*cin)
            x = jnp.maximum(x[..., :cin], x[..., cin:])          # (hp, wp, cin)
        else:
            # x: (cin, hp*wp) lane-dense CHW-flat intermediate; apply the
            # previous stage's BN + ReLU on the fly (per-channel scale/shift).
            x = x_ref[0].astype(jnp.float32)
            if bn_in:
                x = jnp.maximum(x * scale_ref[...] + shift_ref[...], 0.0)
            x = jnp.transpose(x).reshape(hp, wp, cin)            # HWC for im2col

        # ---- halo: zero only the 1-pixel border each step ------------------
        zrow = jnp.zeros((1, wp + 2, cin), jnp.float32)
        zcol = jnp.zeros((hp + 2, 1, cin), jnp.float32)
        pad_ref[0:1, :, :] = zrow
        pad_ref[hp + 1:hp + 2, :, :] = zrow
        pad_ref[:, 0:1, :] = zcol
        pad_ref[:, wp + 1:wp + 2, :] = zcol
        pad_ref[1:hp + 1, 1:wp + 1, :] = x

        # ---- im2col: one (hp*wp, 9*cin) x (cout, 9*cin)^T bf16 matmul ------
        taps = [pad_ref[ky:ky + hp, kx:kx + wp, :].reshape(hp * wp, cin)
                for ky in range(3) for kx in range(3)]
        patches = jnp.concatenate(taps, axis=1).astype(jnp.bfloat16)
        # w_ref: (cout, 9*cin) bf16; contract both operands on their last dim
        # -> result directly in CHW-flat (cout, hp*wp), no output transpose.
        acc = lax.dot_general(w_ref[...], patches,
                              dimension_numbers=(((1,), (1,)), ((), ())),
                              preferred_element_type=jnp.float32)

        # ---- outputs: CHW-flat pre-BN activation (bf16) + BN partials ------
        y_ref[0] = acc.astype(y_ref.dtype)                       # (cout, hp*wp)
        s_ref[...] = jnp.sum(acc, axis=1).reshape(1, 1, cout)
        q_ref[...] = jnp.sum(acc * acc, axis=1).reshape(1, 1, cout)

    return kernel


def _bn_relu_kernel(y_ref, scale_ref, shift_ref, o_ref):
    # Blocks: y/o (1, cout, hp*wp) lane-dense (already NCHW-flat);
    # scale/shift (cout, 1) per-channel.
    y = y_ref[0].astype(jnp.float32)
    o_ref[0] = jnp.maximum(y * scale_ref[...] + shift_ref[...], 0.0)


# --------------------------------------------------------------- wrappers ---

def _conv_stage(x_in, w_t, *, hp, wp, cin, cout, pool, scale=None, shift=None):
    """One fused stage: [pool | BN+ReLU] -> 3x3 conv (im2col) + BN partials."""
    n = x_in.shape[0]
    bn_in = scale is not None

    if pool:
        # x_in: (n, hp, 2, wp, 2*cin) free reshape view of the NHWC input.
        x_spec = pl.BlockSpec((1, hp, 2, wp, 2 * cin),
                              lambda i: (i, 0, 0, 0, 0))
    else:
        # x_in: (n, cin, hp*wp) CHW-flat bf16 intermediate (lane-dense read).
        x_spec = pl.BlockSpec((1, cin, hp * wp), lambda i: (i, 0, 0))

    in_specs = [x_spec,
                pl.BlockSpec((cout, 9 * cin), lambda i: (0, 0))]
    args = [x_in, w_t]
    if bn_in:
        in_specs += [pl.BlockSpec((cin, 1), lambda i: (0, 0)),
                     pl.BlockSpec((cin, 1), lambda i: (0, 0))]
        args += [scale.reshape(cin, 1), shift.reshape(cin, 1)]

    kernel = _make_conv_kernel(pool, bn_in, hp, wp, cin, cout)

    y, s, q = pl.pallas_call(
        kernel,
        out_shape=(jax.ShapeDtypeStruct((n, cout, hp * wp), jnp.bfloat16),
                   jax.ShapeDtypeStruct((n, 1, cout), jnp.float32),
                   jax.ShapeDtypeStruct((n, 1, cout), jnp.float32)),
        grid=(n,),
        in_specs=in_specs,
        out_specs=(pl.BlockSpec((1, cout, hp * wp), lambda i: (i, 0, 0)),
                   pl.BlockSpec((1, 1, cout), lambda i: (i, 0, 0)),
                   pl.BlockSpec((1, 1, cout), lambda i: (i, 0, 0))),
        scratch_shapes=[pltpu.VMEM((hp + 2, wp + 2, cin), jnp.float32)],
        compiler_params=pltpu.CompilerParams(
            dimension_semantics=("parallel",)),
    )(*args)
    return y, s, q


def _finalize_bn(s, q, count):
    """Per-channel train-mode BN: y*scale + shift == (y - mean)/sqrt(var+eps)."""
    total = jnp.sum(s, axis=0).reshape(-1)
    totsq = jnp.sum(q, axis=0).reshape(-1)
    mean = total / count
    var = jnp.maximum(totsq / count - mean * mean, 0.0)   # clamp f32 cancellation
    scale = lax.rsqrt(var + EPS)                           # gamma = 1
    shift = -mean * scale                                  # beta  = 0
    return scale, shift


def _bn_relu_out(y, scale, shift):
    """Final BN-apply + ReLU; reads/writes lane-dense CHW-flat (n, C, H*W)."""
    n, c, flat = y.shape
    return pl.pallas_call(
        _bn_relu_kernel,
        out_shape=jax.ShapeDtypeStruct((n, c, flat), jnp.float32),
        grid=(n,),
        in_specs=[pl.BlockSpec((1, c, flat), lambda i: (i, 0, 0)),
                  pl.BlockSpec((c, 1), lambda i: (0, 0)),
                  pl.BlockSpec((c, 1), lambda i: (0, 0))],
        out_specs=pl.BlockSpec((1, c, flat), lambda i: (i, 0, 0)),
        compiler_params=pltpu.CompilerParams(
            dimension_semantics=("parallel",)),
    )(y, scale.reshape(c, 1), shift.reshape(c, 1))


def down_forward(x_nchw, w1_hwio, w2_hwio):
    """Down: MaxPool2d(2) -> [Conv3x3(p=1, no bias) -> BN -> ReLU] x 2.

    x_nchw: (N, C_in, H, W) float32  ->  (N, C_out, H//2, W//2) float32.
    Weights are HWIO (torch OIHW -> permute(2, 3, 1, 0)).
    """
    n, cin, h, wsp = x_nchw.shape
    hp, wp = h // 2, wsp // 2
    mid = w1_hwio.shape[-1]
    cout = w2_hwio.shape[-1]
    count = float(n * hp * wp)

    # NCHW -> NHWC once, then a free view (n, hp, 2, wp, 2*cin) for the pool.
    x_nhwc = jnp.transpose(x_nchw, (0, 2, 3, 1)).astype(jnp.float32)
    x_view = x_nhwc.reshape(n, hp, 2, wp, 2 * cin)

    # Pre-flatten + pre-transpose conv weights to (cout, 9*cin) bf16.
    w1_t = jnp.transpose(w1_hwio.reshape(9 * cin, mid)).astype(jnp.bfloat16)
    w2_t = jnp.transpose(w2_hwio.reshape(9 * mid, cout)).astype(jnp.bfloat16)

    # stage 1: fused pool + conv1 + BN1 partial sums
    y1, s1, q1 = _conv_stage(x_view, w1_t, hp=hp, wp=wp, cin=cin, cout=mid,
                             pool=True)
    sc1, sh1 = _finalize_bn(s1, q1, count)

    # stage 2: BN1+ReLU on the read path + conv2 + BN2 partial sums
    y2, s2, q2 = _conv_stage(y1, w2_t, hp=hp, wp=wp, cin=mid, cout=cout,
                             pool=False, scale=sc1, shift=sh1)
    sc2, sh2 = _finalize_bn(s2, q2, count)

    # stage 3: BN2 + ReLU, written in NCHW-flat order (output transpose fused)
    out = _bn_relu_out(y2, sc2, sh2)                      # (n, cout, hp*wp)
    return out.reshape(n, cout, hp, wp)                   # free reshape, NCHW


# -------------------------------------------------------------- reference ---

def _ref_down(x_nchw, w1, w2):
    x = jnp.transpose(x_nchw, (0, 2, 3, 1))
    n, h, wsp, c = x.shape
    p = x.reshape(n, h // 2, 2, wsp // 2, 2, c).max(axis=(2, 4))

    def conv_bn_relu(a, w):
        y = lax.conv_general_dilated(
            a, w, (1, 1), "SAME", dimension_numbers=("NHWC", "HWIO", "NHWC"))
        mean = y.mean(axis=(0, 1, 2))
        var = jnp.var(y, axis=(0, 1, 2))
        return jnp.maximum((y - mean) / jnp.sqrt(var + EPS), 0.0)

    a1 = conv_bn_relu(p, w1)
    a2 = conv_bn_relu(a1, w2)
    return jnp.transpose(a2, (0, 3, 1, 2))


if __name__ == "__main__":
    key = jax.random.PRNGKey(0)
    kx, k1, k2 = jax.random.split(key, 3)
    in_ch, out_ch = 4, 8                      # Down(4, 8); ConvBlock mid = out = 8
    x = jax.random.normal(kx, (2, in_ch, 16, 16), jnp.float32)
    w1 = jax.random.normal(k1, (3, 3, in_ch, out_ch), jnp.float32) * 0.1   # HWIO
    w2 = jax.random.normal(k2, (3, 3, out_ch, out_ch), jnp.float32) * 0.1  # HWIO

    out = jax.block_until_ready(jax.jit(down_forward)(x, w1, w2))
    ref = jax.block_until_ready(_ref_down(x, w1, w2))
    assert out.shape == (2, out_ch, 8, 8), out.shape
    max_err = float(jnp.max(jnp.abs(out - ref)))
    # bf16 intermediate activations + bf16 MXU operands -> loosened tolerance
    assert bool(jnp.allclose(out, ref, atol=5e-2, rtol=5e-2)), max_err
    print("KERNEL_OK")
</pallas_src>

<mosaic_0001>
module attributes {stable_mosaic.version = 11 : i64} {
  func.func @kernel(%arg0: i32, %arg1: memref<1x8x2x8x8xf32, #tpu.memory_space<vmem>>, %arg2: memref<8x36xbf16, #tpu.memory_space<vmem>>, %arg3: memref<1x8x64xbf16, #tpu.memory_space<vmem>>, %arg4: memref<1x1x8xf32, #tpu.memory_space<vmem>>, %arg5: memref<1x1x8xf32, #tpu.memory_space<vmem>>, %arg6: memref<10x10x4xf32, #tpu.memory_space<vmem>>) attributes {dimension_semantics = [#tpu.dimension_semantics<parallel>], iteration_bounds = array<i64: 2>, scalar_prefetch = 0 : i64, scratch_operands = 1 : i64, tpu.core_type = #tpu.core_type<tc>, window_params = [{transform_indices = @transform_0, window_bounds = array<i64: 1, 8, 2, 8, 8>}, {pipeline_mode = #tpu.pipeline_mode<synchronous>, transform_indices = @transform_1, window_bounds = array<i64: 8, 36>}, {transform_indices = @transform_2, window_bounds = array<i64: 1, 8, 64>}, {transform_indices = @transform_3, window_bounds = array<i64: 1, 1, 8>}, {transform_indices = @transform_4, window_bounds = array<i64: 1, 1, 8>}]} {
    %c0 = arith.constant 0 : index
    %c0_0 = arith.constant 0 : index
    %c0_1 = arith.constant 0 : index
    %c0_2 = arith.constant 0 : index
    %c0_3 = arith.constant 0 : index
    %0 = vector.load %arg1[%c0, %c0_0, %c0_1, %c0_2, %c0_3] : memref<1x8x2x8x8xf32, #tpu.memory_space<vmem>>, vector<1x8x2x8x8xf32>
    %1 = vector.shape_cast %0 : vector<1x8x2x8x8xf32> to vector<8x2x8x8xf32>
    %2 = vector.extract_strided_slice %1 {offsets = [0, 0, 0, 0], sizes = [8, 1, 8, 8], strides = [1, 1, 1, 1]} : vector<8x2x8x8xf32> to vector<8x1x8x8xf32>
    %3 = vector.shape_cast %2 : vector<8x1x8x8xf32> to vector<8x8x8xf32>
    %4 = vector.extract_strided_slice %1 {offsets = [0, 1, 0, 0], sizes = [8, 1, 8, 8], strides = [1, 1, 1, 1]} : vector<8x2x8x8xf32> to vector<8x1x8x8xf32>
    %5 = vector.shape_cast %4 : vector<8x1x8x8xf32> to vector<8x8x8xf32>
    %6 = arith.maximumf %3, %5 : vector<8x8x8xf32>
    %7 = vector.extract_strided_slice %6 {offsets = [0, 0, 0], sizes = [8, 8, 4], strides = [1, 1, 1]} : vector<8x8x8xf32> to vector<8x8x4xf32>
    %8 = vector.extract_strided_slice %6 {offsets = [0, 0, 4], sizes = [8, 8, 4], strides = [1, 1, 1]} : vector<8x8x8xf32> to vector<8x8x4xf32>
    %9 = arith.maximumf %7, %8 : vector<8x8x4xf32>
    %cst = arith.constant 0.000000e+00 : f32
    %10 = vector.broadcast %cst : f32 to vector<1x10x4xf32>
    %cst_4 = arith.constant 0.000000e+00 : f32
    %11 = vector.broadcast %cst_4 : f32 to vector<10x1x4xf32>
    %c0_5 = arith.constant 0 : index
    %c0_6 = arith.constant 0 : index
    %c0_7 = arith.constant 0 : index
    %12 = vector.load %arg6[%c0_5, %c0_6, %c0_7] : memref<10x10x4xf32, #tpu.memory_space<vmem>>, vector<1x10x4xf32>
    tpu.vector_store %arg6[%c0_5, %c0_6, %c0_7], %10 {strides = array<i32>} : memref<10x10x4xf32, #tpu.memory_space<vmem>>, vector<1x10x4xf32>,
    %c9 = arith.constant 9 : index
    %c0_8 = arith.constant 0 : index
    %c0_9 = arith.constant 0 : index
    %13 = vector.load %arg6[%c9, %c0_8, %c0_9] : memref<10x10x4xf32, #tpu.memory_space<vmem>>, vector<1x10x4xf32>
    tpu.vector_store %arg6[%c9, %c0_8, %c0_9], %10 {strides = array<i32>} : memref<10x10x4xf32, #tpu.memory_space<vmem>>, vector<1x10x4xf32>,
    %c0_10 = arith.constant 0 : index
    %c0_11 = arith.constant 0 : index
    %c0_12 = arith.constant 0 : index
    %14 = vector.load %arg6[%c0_10, %c0_11, %c0_12] : memref<10x10x4xf32, #tpu.memory_space<vmem>>, vector<10x1x4xf32>
    tpu.vector_store %arg6[%c0_10, %c0_11, %c0_12], %11 {strides = array<i32>} : memref<10x10x4xf32, #tpu.memory_space<vmem>>, vector<10x1x4xf32>,
    %c0_13 = arith.constant 0 : index
    %c9_14 = arith.constant 9 : index
    %c0_15 = arith.constant 0 : index
    %15 = vector.load %arg6[%c0_13, %c9_14, %c0_15] : memref<10x10x4xf32, #tpu.memory_space<vmem>>, vector<10x1x4xf32>
    tpu.vector_store %arg6[%c0_13, %c9_14, %c0_15], %11 {strides = array<i32>} : memref<10x10x4xf32, #tpu.memory_space<vmem>>, vector<10x1x4xf32>,
    %c1 = arith.constant 1 : index
    %c1_16 = arith.constant 1 : index
    %c0_17 = arith.constant 0 : index
    %16 = vector.load %arg6[%c1, %c1_16, %c0_17] : memref<10x10x4xf32, #tpu.memory_space<vmem>>, vector<8x8x4xf32>
    tpu.vector_store %arg6[%c1, %c1_16, %c0_17], %9 {strides = array<i32>} : memref<10x10x4xf32, #tpu.memory_space<vmem>>, vector<8x8x4xf32>,
    %c0_18 = arith.constant 0 : index
    %c0_19 = arith.constant 0 : index
    %c0_20 = arith.constant 0 : index
    %17 = vector.load %arg6[%c0_18, %c0_19, %c0_20] : memref<10x10x4xf32, #tpu.memory_space<vmem>>, vector<8x8x4xf32>
    %18 = vector.shape_cast %17 : vector<8x8x4xf32> to vector<64x4xf32>
    %c0_21 = arith.constant 0 : index
    %c1_22 = arith.constant 1 : index
    %c0_23 = arith.constant 0 : index
    %19 = vector.load %arg6[%c0_21, %c1_22, %c0_23] : memref<10x10x4xf32, #tpu.memory_space<vmem>>, vector<8x8x4xf32>
    %20 = vector.shape_cast %19 : vector<8x8x4xf32> to vector<64x4xf32>
    %c0_24 = arith.constant 0 : index
    %c2 = arith.constant 2 : index
    %c0_25 = arith.constant 0 : index
    %21 = vector.load %arg6[%c0_24, %c2, %c0_25] : memref<10x10x4xf32, #tpu.memory_space<vmem>>, vector<8x8x4xf32>
    %22 = vector.shape_cast %21 : vector<8x8x4xf32> to vector<64x4xf32>
    %c1_26 = arith.constant 1 : index
    %c0_27 = arith.constant 0 : index
    %c0_28 = arith.constant 0 : index
    %23 = vector.load %arg6[%c1_26, %c0_27, %c0_28] : memref<10x10x4xf32, #tpu.memory_space<vmem>>, vector<8x8x4xf32>
    %24 = vector.shape_cast %23 : vector<8x8x4xf32> to vector<64x4xf32>
    %c1_29 = arith.constant 1 : index
    %c1_30 = arith.constant 1 : index
    %c0_31 = arith.constant 0 : index
    %25 = vector.load %arg6[%c1_29, %c1_30, %c0_31] : memref<10x10x4xf32, #tpu.memory_space<vmem>>, vector<8x8x4xf32>
    %26 = vector.shape_cast %25 : vector<8x8x4xf32> to vector<64x4xf32>
    %c1_32 = arith.constant 1 : index
    %c2_33 = arith.constant 2 : index
    %c0_34 = arith.constant 0 : index
    %27 = vector.load %arg6[%c1_32, %c2_33, %c0_34] : memref<10x10x4xf32, #tpu.memory_space<vmem>>, vector<8x8x4xf32>
    %28 = vector.shape_cast %27 : vector<8x8x4xf32> to vector<64x4xf32>
    %c2_35 = arith.constant 2 : index
    %c0_36 = arith.constant 0 : index
    %c0_37 = arith.constant 0 : index
    %29 = vector.load %arg6[%c2_35, %c0_36, %c0_37] : memref<10x10x4xf32, #tpu.memory_space<vmem>>, vector<8x8x4xf32>
    %30 = vector.shape_cast %29 : vector<8x8x4xf32> to vector<64x4xf32>
    %c2_38 = arith.constant 2 : index
    %c1_39 = arith.constant 1 : index
    %c0_40 = arith.constant 0 : index
    %31 = vector.load %arg6[%c2_38, %c1_39, %c0_40] : memref<10x10x4xf32, #tpu.memory_space<vmem>>, vector<8x8x4xf32>
    %32 = vector.shape_cast %31 : vector<8x8x4xf32> to vector<64x4xf32>
    %c2_41 = arith.constant 2 : index
    %c2_42 = arith.constant 2 : index
    %c0_43 = arith.constant 0 : index
    %33 = vector.load %arg6[%c2_41, %c2_42, %c0_43] : memref<10x10x4xf32, #tpu.memory_space<vmem>>, vector<8x8x4xf32>
    %34 = vector.shape_cast %33 : vector<8x8x4xf32> to vector<64x4xf32>
    %35 = tpu.concatenate %18, %20, %22, %24, %26, %28, %30, %32, %34 in 1 : vector<64x4xf32>, vector<64x4xf32>, vector<64x4xf32>, vector<64x4xf32>, vector<64x4xf32>, vector<64x4xf32>, vector<64x4xf32>, vector<64x4xf32>, vector<64x4xf32> -> vector<64x36xf32>
    %36 = arith.truncf %35 : vector<64x36xf32> to vector<64x36xbf16>
    %c0_44 = arith.constant 0 : index
    %c0_45 = arith.constant 0 : index
    %37 = vector.load %arg2[%c0_44, %c0_45] : memref<8x36xbf16, #tpu.memory_space<vmem>>, vector<8x36xbf16>
    %cst_46 = arith.constant dense<0.000000e+00> : vector<8x64xf32>
    %38 = tpu.matmul %37, %36, %cst_46 {dimension_numbers = #tpu.dot_dimension_numbers<[1], [1], [0], [0], [0, 0, 1, 0], [], []>} : vector<8x36xbf16>, vector<64x36xbf16>, vector<8x64xf32> -> vector<8x64xf32>
    %39 = arith.truncf %38 : vector<8x64xf32> to vector<8x64xbf16>
    %c0_47 = arith.constant 0 : index
    %c0_48 = arith.constant 0 : index
    %c0_49 = arith.constant 0 : index
    %40 = vector.load %arg3[%c0_47, %c0_48, %c0_49] : memref<1x8x64xbf16, #tpu.memory_space<vmem>>, vector<1x8x64xbf16>
    %41 = vector.shape_cast %40 : vector<1x8x64xbf16> to vector<8x64xbf16>
    %42 = vector.shape_cast %39 : vector<8x64xbf16> to vector<1x8x64xbf16>
    tpu.vector_store %arg3[%c0_47, %c0_48, %c0_49], %42 {strides = array<i32>} : memref<1x8x64xbf16, #tpu.memory_space<vmem>>, vector<1x8x64xbf16>,
    %cst_50 = arith.constant dense<0.000000e+00> : vector<8xf32>
    %43 = vector.multi_reduction <add>, %38, %cst_50 [1] : vector<8x64xf32> to vector<8xf32>
    %44 = vector.shape_cast %43 : vector<8xf32> to vector<1x1x8xf32>
    %c0_51 = arith.constant 0 : index
    %c0_52 = arith.constant 0 : index
    %c0_53 = arith.constant 0 : index
    %45 = vector.load %arg4[%c0_51, %c0_52, %c0_53] : memref<1x1x8xf32, #tpu.memory_space<vmem>>, vector<1x1x8xf32>
    tpu.vector_store %arg4[%c0_51, %c0_52, %c0_53], %44 {strides = array<i32>} : memref<1x1x8xf32, #tpu.memory_space<vmem>>, vector<1x1x8xf32>,
    %46 = arith.mulf %38, %38 : vector<8x64xf32>
    %cst_54 = arith.constant dense<0.000000e+00> : vector<8xf32>
    %47 = vector.multi_reduction <add>, %46, %cst_54 [1] : vector<8x64xf32> to vector<8xf32>
    %48 = vector.shape_cast %47 : vector<8xf32> to vector<1x1x8xf32>
    %c0_55 = arith.constant 0 : index
    %c0_56 = arith.constant 0 : index
    %c0_57 = arith.constant 0 : index
    %49 = vector.load %arg5[%c0_55, %c0_56, %c0_57] : memref<1x1x8xf32, #tpu.memory_space<vmem>>, vector<1x1x8xf32>
    tpu.vector_store %arg5[%c0_55, %c0_56, %c0_57], %48 {strides = array<i32>} : memref<1x1x8xf32, #tpu.memory_space<vmem>>, vector<1x1x8xf32>,
    return
  }
  func.func @transform_0(%arg0: i32) -> (i32, i32, i32, i32, i32) {
    %c0_i32 = arith.constant 0 : i32
    %c0_i32_0 = arith.constant 0 : i32
    %c0_i32_1 = arith.constant 0 : i32
    %c0_i32_2 = arith.constant 0 : i32
    %c0_i32_3 = arith.constant 0 : i32
    return %arg0, %c0_i32, %c0_i32_0, %c0_i32_1, %c0_i32_2 : i32, i32, i32, i32, i32
  }
  func.func @transform_1(%arg0: i32) -> (i32, i32) {
    %c0_i32 = arith.constant 0 : i32
    %c0_i32_0 = arith.constant 0 : i32
    %c0_i32_1 = arith.constant 0 : i32
    return %c0_i32, %c0_i32_0 : i32, i32
  }
  func.func @transform_2(%arg0: i32) -> (i32, i32, i32) {
    %c0_i32 = arith.constant 0 : i32
    %c0_i32_0 = arith.constant 0 : i32
    %c0_i32_1 = arith.constant 0 : i32
    return %arg0, %c0_i32, %c0_i32_0 : i32, i32, i32
  }
  func.func @transform_3(%arg0: i32) -> (i32, i32, i32) {
    %c0_i32 = arith.constant 0 : i32
    %c0_i32_0 = arith.constant 0 : i32
    %c0_i32_1 = arith.constant 0 : i32
    return %arg0, %c0_i32, %c0_i32_0 : i32, i32, i32
  }
  func.func @transform_4(%arg0: i32) -> (i32, i32, i32) {
    %c0_i32 = arith.constant 0 : i32
    %c0_i32_0 = arith.constant 0 : i32
    %c0_i32_1 = arith.constant 0 : i32
    return %arg0, %c0_i32, %c0_i32_0 : i32, i32, i32
  }
}

module attributes {stable_mosaic.version = 11 : i64} {
  func.func @kernel(%arg0: i32, %arg1: memref<1x8x64xbf16, #tpu.memory_space<vmem>>, %arg2: memref<8x72xbf16, #tpu.memory_space<vmem>>, %arg3: memref<8x1xf32, #tpu.memory_space<vmem>>, %arg4: memref<8x1xf32, #tpu.memory_space<vmem>>, %arg5: memref<1x8x64xbf16, #tpu.memory_space<vmem>>, %arg6: memref<1x1x8xf32, #tpu.memory_space<vmem>>, %arg7: memref<1x1x8xf32, #tpu.memory_space<vmem>>, %arg8: memref<10x10x8xf32, #tpu.memory_space<vmem>>) attributes {dimension_semantics = [#tpu.dimension_semantics<parallel>], iteration_bounds = array<i64: 2>, scalar_prefetch = 0 : i64, scratch_operands = 1 : i64, tpu.core_type = #tpu.core_type<tc>, window_params = [{transform_indices = @transform_0, window_bounds = array<i64: 1, 8, 64>}, {pipeline_mode = #tpu.pipeline_mode<synchronous>, transform_indices = @transform_1, window_bounds = array<i64: 8, 72>}, {pipeline_mode = #tpu.pipeline_mode<synchronous>, transform_indices = @transform_2, window_bounds = array<i64: 8, 1>}, {pipeline_mode = #tpu.pipeline_mode<synchronous>, transform_indices = @transform_3, window_bounds = array<i64: 8, 1>}, {transform_indices = @transform_4, window_bounds = array<i64: 1, 8, 64>}, {transform_indices = @transform_5, window_bounds = array<i64: 1, 1, 8>}, {transform_indices = @transform_6, window_bounds = array<i64: 1, 1, 8>}]} {
    %c0 = arith.constant 0 : index
    %c0_0 = arith.constant 0 : index
    %c0_1 = arith.constant 0 : index
    %0 = vector.load %arg1[%c0, %c0_0, %c0_1] : memref<1x8x64xbf16, #tpu.memory_space<vmem>>, vector<1x8x64xbf16>
    %1 = vector.shape_cast %0 : vector<1x8x64xbf16> to vector<8x64xbf16>
    %2 = arith.extf %1 : vector<8x64xbf16> to vector<8x64xf32>
    %c0_2 = arith.constant 0 : index
    %c0_3 = arith.constant 0 : index
    %3 = vector.load %arg3[%c0_2, %c0_3] : memref<8x1xf32, #tpu.memory_space<vmem>>, vector<8x1xf32>
    %4 = vector.broadcast %3 : vector<8x1xf32> to vector<8x64xf32>
    %5 = arith.mulf %2, %4 : vector<8x64xf32>
    %c0_4 = arith.constant 0 : index
    %c0_5 = arith.constant 0 : index
    %6 = vector.load %arg4[%c0_4, %c0_5] : memref<8x1xf32, #tpu.memory_space<vmem>>, vector<8x1xf32>
    %7 = vector.broadcast %6 : vector<8x1xf32> to vector<8x64xf32>
    %8 = arith.addf %5, %7 : vector<8x64xf32>
    %cst = arith.constant 0.000000e+00 : f32
    %9 = vector.broadcast %cst : f32 to vector<8x64xf32>
    %10 = arith.maximumf %8, %9 : vector<8x64xf32>
    %11 = tpu.transpose %10, [1, 0] : vector<8x64xf32> -> vector<64x8xf32>
    %12 = vector.shape_cast %11 : vector<64x8xf32> to vector<8x8x8xf32>
    %cst_6 = arith.constant 0.000000e+00 : f32
    %13 = vector.broadcast %cst_6 : f32 to vector<1x10x8xf32>
    %cst_7 = arith.constant 0.000000e+00 : f32
    %14 = vector.broadcast %cst_7 : f32 to vector<10x1x8xf32>
    %c0_8 = arith.constant 0 : index
    %c0_9 = arith.constant 0 : index
    %c0_10 = arith.constant 0 : index
    %15 = vector.load %arg8[%c0_8, %c0_9, %c0_10] : memref<10x10x8xf32, #tpu.memory_space<vmem>>, vector<1x10x8xf32>
    tpu.vector_store %arg8[%c0_8, %c0_9, %c0_10], %13 {strides = array<i32>} : memref<10x10x8xf32, #tpu.memory_space<vmem>>, vector<1x10x8xf32>,
    %c9 = arith.constant 9 : index
    %c0_11 = arith.constant 0 : index
    %c0_12 = arith.constant 0 : index
    %16 = vector.load %arg8[%c9, %c0_11, %c0_12] : memref<10x10x8xf32, #tpu.memory_space<vmem>>, vector<1x10x8xf32>
    tpu.vector_store %arg8[%c9, %c0_11, %c0_12], %13 {strides = array<i32>} : memref<10x10x8xf32, #tpu.memory_space<vmem>>, vector<1x10x8xf32>,
    %c0_13 = arith.constant 0 : index
    %c0_14 = arith.constant 0 : index
    %c0_15 = arith.constant 0 : index
    %17 = vector.load %arg8[%c0_13, %c0_14, %c0_15] : memref<10x10x8xf32, #tpu.memory_space<vmem>>, vector<10x1x8xf32>
    tpu.vector_store %arg8[%c0_13, %c0_14, %c0_15], %14 {strides = array<i32>} : memref<10x10x8xf32, #tpu.memory_space<vmem>>, vector<10x1x8xf32>,
    %c0_16 = arith.constant 0 : index
    %c9_17 = arith.constant 9 : index
    %c0_18 = arith.constant 0 : index
    %18 = vector.load %arg8[%c0_16, %c9_17, %c0_18] : memref<10x10x8xf32, #tpu.memory_space<vmem>>, vector<10x1x8xf32>
    tpu.vector_store %arg8[%c0_16, %c9_17, %c0_18], %14 {strides = array<i32>} : memref<10x10x8xf32, #tpu.memory_space<vmem>>, vector<10x1x8xf32>,
    %c1 = arith.constant 1 : index
    %c1_19 = arith.constant 1 : index
    %c0_20 = arith.constant 0 : index
    %19 = vector.load %arg8[%c1, %c1_19, %c0_20] : memref<10x10x8xf32, #tpu.memory_space<vmem>>, vector<8x8x8xf32>
    tpu.vector_store %arg8[%c1, %c1_19, %c0_20], %12 {strides = array<i32>} : memref<10x10x8xf32, #tpu.memory_space<vmem>>, vector<8x8x8xf32>,
    %c0_21 = arith.constant 0 : index
    %c0_22 = arith.constant 0 : index
    %c0_23 = arith.constant 0 : index
    %20 = vector.load %arg8[%c0_21, %c0_22, %c0_23] : memref<10x10x8xf32, #tpu.memory_space<vmem>>, vector<8x8x8xf32>
    %21 = vector.shape_cast %20 : vector<8x8x8xf32> to vector<64x8xf32>
    %c0_24 = arith.constant 0 : index
    %c1_25 = arith.constant 1 : index
    %c0_26 = arith.constant 0 : index
    %22 = vector.load %arg8[%c0_24, %c1_25, %c0_26] : memref<10x10x8xf32, #tpu.memory_space<vmem>>, vector<8x8x8xf32>
    %23 = vector.shape_cast %22 : vector<8x8x8xf32> to vector<64x8xf32>
    %c0_27 = arith.constant 0 : index
    %c2 = arith.constant 2 : index
    %c0_28 = arith.constant 0 : index
    %24 = vector.load %arg8[%c0_27, %c2, %c0_28] : memref<10x10x8xf32, #tpu.memory_space<vmem>>, vector<8x8x8xf32>
    %25 = vector.shape_cast %24 : vector<8x8x8xf32> to vector<64x8xf32>
    %c1_29 = arith.constant 1 : index
    %c0_30 = arith.constant 0 : index
    %c0_31 = arith.constant 0 : index
    %26 = vector.load %arg8[%c1_29, %c0_30, %c0_31] : memref<10x10x8xf32, #tpu.memory_space<vmem>>, vector<8x8x8xf32>
    %27 = vector.shape_cast %26 : vector<8x8x8xf32> to vector<64x8xf32>
    %c1_32 = arith.constant 1 : index
    %c1_33 = arith.constant 1 : index
    %c0_34 = arith.constant 0 : index
    %28 = vector.load %arg8[%c1_32, %c1_33, %c0_34] : memref<10x10x8xf32, #tpu.memory_space<vmem>>, vector<8x8x8xf32>
    %29 = vector.shape_cast %28 : vector<8x8x8xf32> to vector<64x8xf32>
    %c1_35 = arith.constant 1 : index
    %c2_36 = arith.constant 2 : index
    %c0_37 = arith.constant 0 : index
    %30 = vector.load %arg8[%c1_35, %c2_36, %c0_37] : memref<10x10x8xf32, #tpu.memory_space<vmem>>, vector<8x8x8xf32>
    %31 = vector.shape_cast %30 : vector<8x8x8xf32> to vector<64x8xf32>
    %c2_38 = arith.constant 2 : index
    %c0_39 = arith.constant 0 : index
    %c0_40 = arith.constant 0 : index
    %32 = vector.load %arg8[%c2_38, %c0_39, %c0_40] : memref<10x10x8xf32, #tpu.memory_space<vmem>>, vector<8x8x8xf32>
    %33 = vector.shape_cast %32 : vector<8x8x8xf32> to vector<64x8xf32>
    %c2_41 = arith.constant 2 : index
    %c1_42 = arith.constant 1 : index
    %c0_43 = arith.constant 0 : index
    %34 = vector.load %arg8[%c2_41, %c1_42, %c0_43] : memref<10x10x8xf32, #tpu.memory_space<vmem>>, vector<8x8x8xf32>
    %35 = vector.shape_cast %34 : vector<8x8x8xf32> to vector<64x8xf32>
    %c2_44 = arith.constant 2 : index
    %c2_45 = arith.constant 2 : index
    %c0_46 = arith.constant 0 : index
    %36 = vector.load %arg8[%c2_44, %c2_45, %c0_46] : memref<10x10x8xf32, #tpu.memory_space<vmem>>, vector<8x8x8xf32>
    %37 = vector.shape_cast %36 : vector<8x8x8xf32> to vector<64x8xf32>
    %38 = tpu.concatenate %21, %23, %25, %27, %29, %31, %33, %35, %37 in 1 : vector<64x8xf32>, vector<64x8xf32>, vector<64x8xf32>, vector<64x8xf32>, vector<64x8xf32>, vector<64x8xf32>, vector<64x8xf32>, vector<64x8xf32>, vector<64x8xf32> -> vector<64x72xf32>
    %39 = arith.truncf %38 : vector<64x72xf32> to vector<64x72xbf16>
    %c0_47 = arith.constant 0 : index
    %c0_48 = arith.constant 0 : index
    %40 = vector.load %arg2[%c0_47, %c0_48] : memref<8x72xbf16, #tpu.memory_space<vmem>>, vector<8x72xbf16>
    %cst_49 = arith.constant dense<0.000000e+00> : vector<8x64xf32>
    %41 = tpu.matmul %40, %39, %cst_49 {dimension_numbers = #tpu.dot_dimension_numbers<[1], [1], [0], [0], [0, 0, 1, 0], [], []>} : vector<8x72xbf16>, vector<64x72xbf16>, vector<8x64xf32> -> vector<8x64xf32>
    %42 = arith.truncf %41 : vector<8x64xf32> to vector<8x64xbf16>
    %c0_50 = arith.constant 0 : index
    %c0_51 = arith.constant 0 : index
    %c0_52 = arith.constant 0 : index
    %43 = vector.load %arg5[%c0_50, %c0_51, %c0_52] : memref<1x8x64xbf16, #tpu.memory_space<vmem>>, vector<1x8x64xbf16>
    %44 = vector.shape_cast %43 : vector<1x8x64xbf16> to vector<8x64xbf16>
    %45 = vector.shape_cast %42 : vector<8x64xbf16> to vector<1x8x64xbf16>
    tpu.vector_store %arg5[%c0_50, %c0_51, %c0_52], %45 {strides = array<i32>} : memref<1x8x64xbf16, #tpu.memory_space<vmem>>, vector<1x8x64xbf16>,
    %cst_53 = arith.constant dense<0.000000e+00> : vector<8xf32>
    %46 = vector.multi_reduction <add>, %41, %cst_53 [1] : vector<8x64xf32> to vector<8xf32>
    %47 = vector.shape_cast %46 : vector<8xf32> to vector<1x1x8xf32>
    %c0_54 = arith.constant 0 : index
    %c0_55 = arith.constant 0 : index
    %c0_56 = arith.constant 0 : index
    %48 = vector.load %arg6[%c0_54, %c0_55, %c0_56] : memref<1x1x8xf32, #tpu.memory_space<vmem>>, vector<1x1x8xf32>
    tpu.vector_store %arg6[%c0_54, %c0_55, %c0_56], %47 {strides = array<i32>} : memref<1x1x8xf32, #tpu.memory_space<vmem>>, vector<1x1x8xf32>,
    %49 = arith.mulf %41, %41 : vector<8x64xf32>
    %cst_57 = arith.constant dense<0.000000e+00> : vector<8xf32>
    %50 = vector.multi_reduction <add>, %49, %cst_57 [1] : vector<8x64xf32> to vector<8xf32>
    %51 = vector.shape_cast %50 : vector<8xf32> to vector<1x1x8xf32>
    %c0_58 = arith.constant 0 : index
    %c0_59 = arith.constant 0 : index
    %c0_60 = arith.constant 0 : index
    %52 = vector.load %arg7[%c0_58, %c0_59, %c0_60] : memref<1x1x8xf32, #tpu.memory_space<vmem>>, vector<1x1x8xf32>
    tpu.vector_store %arg7[%c0_58, %c0_59, %c0_60], %51 {strides = array<i32>} : memref<1x1x8xf32, #tpu.memory_space<vmem>>, vector<1x1x8xf32>,
    return
  }
  func.func @transform_0(%arg0: i32) -> (i32, i32, i32) {
    %c0_i32 = arith.constant 0 : i32
    %c0_i32_0 = arith.constant 0 : i32
    %c0_i32_1 = arith.constant 0 : i32
    return %arg0, %c0_i32, %c0_i32_0 : i32, i32, i32
  }
  func.func @transform_1(%arg0: i32) -> (i32, i32) {
    %c0_i32 = arith.constant 0 : i32
    %c0_i32_0 = arith.constant 0 : i32
    %c0_i32_1 = arith.constant 0 : i32
    return %c0_i32, %c0_i32_0 : i32, i32
  }
  func.func @transform_2(%arg0: i32) -> (i32, i32) {
    %c0_i32 = arith.constant 0 : i32
    %c0_i32_0 = arith.constant 0 : i32
    %c0_i32_1 = arith.constant 0 : i32
    return %c0_i32, %c0_i32_0 : i32, i32
  }
  func.func @transform_3(%arg0: i32) -> (i32, i32) {
    %c0_i32 = arith.constant 0 : i32
    %c0_i32_0 = arith.constant 0 : i32
    %c0_i32_1 = arith.constant 0 : i32
    return %c0_i32, %c0_i32_0 : i32, i32
  }
  func.func @transform_4(%arg0: i32) -> (i32, i32, i32) {
    %c0_i32 = arith.constant 0 : i32
    %c0_i32_0 = arith.constant 0 : i32
    %c0_i32_1 = arith.constant 0 : i32
    return %arg0, %c0_i32, %c0_i32_0 : i32, i32, i32
  }
  func.func @transform_5(%arg0: i32) -> (i32, i32, i32) {
    %c0_i32 = arith.constant 0 : i32
    %c0_i32_0 = arith.constant 0 : i32
    %c0_i32_1 = arith.constant 0 : i32
    return %arg0, %c0_i32, %c0_i32_0 : i32, i32, i32
  }
  func.func @transform_6(%arg0: i32) -> (i32, i32, i32) {
    %c0_i32 = arith.constant 0 : i32
    %c0_i32_0 = arith.constant 0 : i32
    %c0_i32_1 = arith.constant 0 : i32
    return %arg0, %c0_i32, %c0_i32_0 : i32, i32, i32
  }
}

module attributes {stable_mosaic.version = 11 : i64} {
  func.func @_bn_relu_kernel(%arg0: i32, %arg1: memref<1x8x64xbf16, #tpu.memory_space<vmem>>, %arg2: memref<8x1xf32, #tpu.memory_space<vmem>>, %arg3: memref<8x1xf32, #tpu.memory_space<vmem>>, %arg4: memref<1x8x64xf32, #tpu.memory_space<vmem>>) attributes {dimension_semantics = [#tpu.dimension_semantics<parallel>], iteration_bounds = array<i64: 2>, scalar_prefetch = 0 : i64, scratch_operands = 0 : i64, tpu.core_type = #tpu.core_type<tc>, window_params = [{transform_indices = @transform_0, window_bounds = array<i64: 1, 8, 64>}, {pipeline_mode = #tpu.pipeline_mode<synchronous>, transform_indices = @transform_1, window_bounds = array<i64: 8, 1>}, {pipeline_mode = #tpu.pipeline_mode<synchronous>, transform_indices = @transform_2, window_bounds = array<i64: 8, 1>}, {transform_indices = @transform_3, window_bounds = array<i64: 1, 8, 64>}]} {
    %c0 = arith.constant 0 : index
    %c0_0 = arith.constant 0 : index
    %c0_1 = arith.constant 0 : index
    %0 = vector.load %arg1[%c0, %c0_0, %c0_1] : memref<1x8x64xbf16, #tpu.memory_space<vmem>>, vector<1x8x64xbf16>
    %1 = vector.shape_cast %0 : vector<1x8x64xbf16> to vector<8x64xbf16>
    %2 = arith.extf %1 : vector<8x64xbf16> to vector<8x64xf32>
    %c0_2 = arith.constant 0 : index
    %c0_3 = arith.constant 0 : index
    %3 = vector.load %arg2[%c0_2, %c0_3] : memref<8x1xf32, #tpu.memory_space<vmem>>, vector<8x1xf32>
    %4 = vector.broadcast %3 : vector<8x1xf32> to vector<8x64xf32>
    %5 = arith.mulf %2, %4 : vector<8x64xf32>
    %c0_4 = arith.constant 0 : index
    %c0_5 = arith.constant 0 : index
    %6 = vector.load %arg3[%c0_4, %c0_5] : memref<8x1xf32, #tpu.memory_space<vmem>>, vector<8x1xf32>
    %7 = vector.broadcast %6 : vector<8x1xf32> to vector<8x64xf32>
    %8 = arith.addf %5, %7 : vector<8x64xf32>
    %cst = arith.constant 0.000000e+00 : f32
    %9 = vector.broadcast %cst : f32 to vector<8x64xf32>
    %10 = arith.maximumf %8, %9 : vector<8x64xf32>
    %c0_6 = arith.constant 0 : index
    %c0_7 = arith.constant 0 : index
    %c0_8 = arith.constant 0 : index
    %11 = vector.load %arg4[%c0_6, %c0_7, %c0_8] : memref<1x8x64xf32, #tpu.memory_space<vmem>>, vector<1x8x64xf32>
    %12 = vector.shape_cast %11 : vector<1x8x64xf32> to vector<8x64xf32>
    %13 = vector.shape_cast %10 : vector<8x64xf32> to vector<1x8x64xf32>
    tpu.vector_store %arg4[%c0_6, %c0_7, %c0_8], %13 {strides = array<i32>} : memref<1x8x64xf32, #tpu.memory_space<vmem>>, vector<1x8x64xf32>,
    return
  }
  func.func @transform_0(%arg0: i32) -> (i32, i32, i32) {
    %c0_i32 = arith.constant 0 : i32
    %c0_i32_0 = arith.constant 0 : i32
    %c0_i32_1 = arith.constant 0 : i32
    return %arg0, %c0_i32, %c0_i32_0 : i32, i32, i32
  }
  func.func @transform_1(%arg0: i32) -> (i32, i32) {
    %c0_i32 = arith.constant 0 : i32
    %c0_i32_0 = arith.constant 0 : i32
    %c0_i32_1 = arith.constant 0 : i32
    return %c0_i32, %c0_i32_0 : i32, i32
  }
  func.func @transform_2(%arg0: i32) -> (i32, i32) {
    %c0_i32 = arith.constant 0 : i32
    %c0_i32_0 = arith.constant 0 : i32
    %c0_i32_1 = arith.constant 0 : i32
    return %c0_i32, %c0_i32_0 : i32, i32
  }
  func.func @transform_3(%arg0: i32) -> (i32, i32, i32) {
    %c0_i32 = arith.constant 0 : i32
    %c0_i32_0 = arith.constant 0 : i32
    %c0_i32_1 = arith.constant 0 : i32
    return %arg0, %c0_i32, %c0_i32_0 : i32, i32, i32
  }
}

</mosaic_0001>

<bundles_post_ra>
// kernel: mul.36
= control target key start
LH: loop header
LB: loop body
LE: loop exit
PB: predicated region body
PF: predicated region fallthrough
CT: control target
= control target key end

     0   :  { %s34_s0 = inlined_call_operand.vmem [shape: f32[8,1], index: 0, kind: input, shape index: {}]   ;;  %s35_s1 = inlined_call_operand.vmem [shape: f32[8,1], index: 1, kind: input, shape index: {}]   ;;  %s36_s2 = inlined_call_operand.vmem [shape: f32[8,1], index: 2, kind: output, shape index: {}]  }
   0x1   :  { %v3_v0 = vld [vmem:[%s34_s0] sm:$0xff] }
   0x2   :  { %v4_v1 = vld [vmem:[%s35_s1] sm:$0xff] }
   0x3   :  { %v7_v2 = vmul.f32 %v4_v1, %v3_v0 }
   0x5   :  { %9 = vst [vmem:[%s36_s2] sm:$0xff] %v7_v2 }

// kernel: down_forward.5
= control target key start
LH: loop header
LB: loop body
LE: loop exit
PB: predicated region body
PF: predicated region fallthrough
CT: control target
= control target key end

     0   :  { %s286_s12 = smov 0   ;;  %s309_s0 = inlined_call_operand.vmem [shape: bf16[2,8,64], index: 0, kind: input, shape index: {}]   ;;  %s310_s1 = inlined_call_operand.vmem [shape: f32[8,1], index: 1, kind: input, shape index: {}]   ;;  %s311_s2 = inlined_call_operand.vmem [shape: f32[8,1], index: 2, kind: input, shape index: {}]   ;;  %s312_s3 = inlined_call_operand.vmem [shape: f32[2,8,64], index: 3, kind: output, shape index: {}]  }
   0x1 LB: > { %s238_s13 = sadd.s32 4294967295, %s263_s12   ;;  %p242_p0 = scmp.ge.s32.totalorder %s263_s12, 1  ;;  %s263_s12 = sphi %s286_s12, %s13_s12  }
   0x2   : > { %p136_p1 = scmp.lt.s32.totalorder %s263_s12, 3 }
   0x4   : > { %p137_p2 = pnand %p242_p0, %p136_p1 }
   0x5   : > { %v168_v0 = vld [vmem:[%s310_s1] sm:$0xff] (!%p137_p2)  ;;  %v265_v1 = vmov (!%p137_p2), 0   ;;  %p158_p3 = scmp.lt.s32.totalorder (!%p137_p2), %s238_s13, 1  ;;  %vm183_vm0 = vcmask (!%p137_p2), 523264  }
   0x6   : > { %140 = sbr.rel (%p137_p2) target bundleno = 144 (0x90), region = 32  ;;  %256 = vset.pattern.permute.xlu0 (!%p137_p2), %v265_v1  ;;  %v175_v2 = vld [vmem:[%s311_s2] sm:$0xff] (!%p137_p2) }
   0x7   : > { %171 = vperm.xlu0 (!%p137_p2), %256, %v168_v0  }
   0xb   : > { %178 = vperm.xlu0 (!%p137_p2), %256, %v175_v2  }
   0xd   : > { %s314_s13 = smov (!%p158_p3, %s238_s13), 1 }
   0xe   : > { %s243_s18 = sshll.u32 %s314_s13, 2  ;;  %s244_s22 = sshll.u32 %s314_s13, 3 }
   0xf   : > { %s161_s21 = scalar_lea.vmem %s309_s0, %s243_s18  ;;  %s165_s25 = scalar_lea.vmem %s312_s3, %s244_s22 }
  0x10   : > { %v166_v3 = vld [vmem:[%s161_s21] sm:$0xf] }
  0x11   : > { %v167_v4 = vunpack.c.l.bf16 %v166_v3 }
  0x86   : > { %v172_v5 = vpop.permute.xlu0 %171 }
  0x87   : > { %v174_v6 = vmul.f32 %v172_v5, %v167_v4 }
  0x8a   : > { %v179_v7 = vpop.permute.xlu0 %178 }
  0x8b   : > { %v181_v8 = vadd.f32 %v179_v7, %v174_v6 }
  0x8d   : > { %v182_v9 = vmax.f32 %v181_v8, 0.0 }
  0x8f   : > { %184 = vst.msk [vmem:[%s165_s25] sm:$0xff] %vm183_vm0, %v182_v9 }
  0x90 PF: > { %s13_s12 = sadd.s32 1, %s263_s12  }
  0x91   : > { %p10_p4 = scmp.ge.s32.totalorder %s13_s12, 4  }
  0x93   :  { %12 = sbr.rel (!%p10_p4) target bundleno = 1 (0x1), region = 62 }

// kernel: down_forward.4
= control target key start
LH: loop header
LB: loop body
LE: loop exit
PB: predicated region body
PF: predicated region fallthrough
CT: control target
= control target key end

     0   :  { %s1202_s21 = smov 0   ;;  %s1445_s0 = inlined_call_operand.vmem [shape: bf16[2,8,64], index: 0, kind: input, shape index: {}]   ;;  %s1446_s1 = inlined_call_operand.vmem [shape: bf16[8,72], index: 1, kind: input, shape index: {}]   ;;  %s1447_s2 = inlined_call_operand.vmem [shape: f32[8,1], index: 2, kind: input, shape index: {}]   ;;  %s1448_s3 = inlined_call_operand.vmem [shape: f32[8,1], index: 3, kind: input, shape index: {}]   ;;  %s1449_s4 = inlined_call_operand.vmem [shape: bf16[2,8,64], index: 4, kind: output, shape index: {0}]   ;;  %s1450_s5 = inlined_call_operand.vmem [shape: f32[2,1,8], index: 5, kind: output, shape index: {1}]   ;;  %s1451_s6 = inlined_call_operand.vmem [shape: f32[2,1,8], index: 6, kind: output, shape index: {2}]  }
   0x1 LB: > { %s941_s22 = sadd.s32 4294967295, %s1154_s21   ;;  %p945_p0 = scmp.ge.s32.totalorder %s1154_s21, 1  ;;  %s1154_s21 = sphi %s1202_s21, %s17_s21  }
   0x2   : > { %p216_p1 = scmp.lt.s32.totalorder %s1154_s21, 3 }
   0x4   : > { %p217_p2 = pnand %p945_p0, %p216_p1 }
   0x5   : > { %v267_v0 = vld [vmem:[%s1447_s2] sm:$0xff] (!%p217_p2)  ;;  %v1156_v1 = vmov (!%p217_p2), 0   ;;  %p250_p3 = scmp.lt.s32.totalorder (!%p217_p2), %s941_s22, 1  ;;  %vm314_vm0 = vcmask (!%p217_p2), 64512   ;;  %vm316_vm1 = vcmask (!%p217_p2), 58368   ;;  %v1157_v10 = vmov (!%p217_p2), 0.0  }
   0x6   : > { %220 = sbr.rel (%p217_p2) target bundleno = 855 (0x357), region = 36  ;;  %987 = vset.pattern.permute.xlu0 (!%p217_p2), %v1156_v1  ;;  %v274_v2 = vld [vmem:[%s1448_s3] sm:$0xff] (!%p217_p2)  ;;  %315 = vst.msk [vmem:[#allocation2] sm:$0xff] (!%p217_p2), %vm314_vm0, %v1157_v10  ;;  %vm321_vm2 = vcmask (!%p217_p2), 57344   ;;  %319 = vst.msk [vmem:[#allocation2 + $0x90] sm:$0xff] (!%p217_p2), %vm314_vm0, %v1157_v10  ;;  %956 = vmatprep.subr.bf16.mxu0 (!%p217_p2), %v1157_v10  ;;  %s1158_s7 = smov (!%p217_p2), 16  }
   0x7   : > { %270 = vperm.xlu0 (!%p217_p2), %987, %v267_v0   ;;  %317 = vst.msk [vmem:[#allocation2 + $0x8] sm:$0x3] (!%p217_p2), %vm316_vm1, %v1157_v10  ;;  %320 = vst.msk [vmem:[#allocation2 + $0x98] sm:$0x3] (!%p217_p2), %vm316_vm1, %v1157_v10  ;;  %s1159_s8 = smov (!%p217_p2), 8   ;;  %s1160_s9 = smov (!%p217_p2), 24  }
   0x8   : > { %332 = vst.msk [vmem:[#allocation2 + $0x9] sm:$0x1] (!%p217_p2), %vm321_vm2, %v1157_v10  ;;  %333 = vst.msk [vmem:[#allocation2 + $0x19] sm:$0x1] (!%p217_p2), %vm321_vm2, %v1157_v10  ;;  %s1161_s10 = smov (!%p217_p2), 32   ;;  %s1162_s11 = smov (!%p217_p2), 40  }
   0x9   : > { %322 = vst.msk [vmem:[#allocation2] sm:$0x1] (!%p217_p2), %vm321_vm2, %v1157_v10  ;;  %323 = vst.msk [vmem:[#allocation2 + $0x10] sm:$0x1] (!%p217_p2), %vm321_vm2, %v1157_v10  ;;  %s1163_s12 = smov (!%p217_p2), 48   ;;  %s1164_s13 = smov (!%p217_p2), 64  }
   0xa   : > { %324 = vst.msk [vmem:[#allocation2 + $0x20] sm:$0x1] (!%p217_p2), %vm321_vm2, %v1157_v10  ;;  %325 = vst.msk [vmem:[#allocation2 + $0x30] sm:$0x1] (!%p217_p2), %vm321_vm2, %v1157_v10  ;;  %s1165_s14 = smov (!%p217_p2), 56   ;;  %vm1166_vm3 = vmmov (!%p217_p2), 0  }
   0xb   : > { %277 = vperm.xlu0 (!%p217_p2), %987, %v274_v2   ;;  %326 = vst.msk [vmem:[#allocation2 + $0x40] sm:$0x1] (!%p217_p2), %vm321_vm2, %v1157_v10  ;;  %327 = vst.msk [vmem:[#allocation2 + $0x50] sm:$0x1] (!%p217_p2), %vm321_vm2, %v1157_v10  ;;  %964 = vmatprep.mubr.msk.bf16.mxu0 (!%p217_p2), %vm1166_vm3, %v1157_v10  ;;  %vm688_vm4 = vcmask (!%p217_p2), 130048   ;;  %vm697_vm5 = vcmask (!%p217_p2), 195584  }
   0xc   : > { %328 = vst.msk [vmem:[#allocation2 + $0x60] sm:$0x1] (!%p217_p2), %vm321_vm2, %v1157_v10  ;;  %329 = vst.msk [vmem:[#allocation2 + $0x70] sm:$0x1] (!%p217_p2), %vm321_vm2, %v1157_v10  ;;  %vm706_vm6 = vcmask (!%p217_p2), 261120   ;;  %vm715_vm7 = vcmask (!%p217_p2), 326656  }
   0xd   : > { %s1453_s22 = smov (!%p250_p3, %s941_s22), 1  ;;  %330 = vst.msk [vmem:[#allocation2 + $0x80] sm:$0x1] %vm321_vm2, %v1157_v10  ;;  %334 = vst.msk [vmem:[#allocation2 + $0x29] sm:$0x1] %vm321_vm2, %v1157_v10  ;;  %vm724_vm8 = vcmask 392192  }
   0xe   : > { %s946_s27 = sshll.u32 %s1453_s22, 2  ;;  %335 = vst.msk [vmem:[#allocation2 + $0x39] sm:$0x1] %vm321_vm2, %v1157_v10  ;;  %336 = vst.msk [vmem:[#allocation2 + $0x49] sm:$0x1] %vm321_vm2, %v1157_v10  ;;  %v359_v14 = vld [vmem:[#allocation2 + $0x1] sm:$0xff]  ;;  %s260_s24 = scalar_lea.vmem %s1450_s5, %s1453_s22 }
   0xf   : > { %s253_s30 = scalar_lea.vmem %s1445_s0, %s946_s27  ;;  %337 = vst.msk [vmem:[#allocation2 + $0x59] sm:$0x1] %vm321_vm2, %v1157_v10  ;;  %338 = vst.msk [vmem:[#allocation2 + $0x69] sm:$0x1] %vm321_vm2, %v1157_v10  ;;  %v367_v13 = vld [vmem:[#allocation2 + $0x2] sm:$0xff]  ;;  %vm733_vm9 = vcmask 457728   ;;  %s257_s19 = scalar_lea.vmem %s1449_s4, %s946_s27 }
  0x10   : > { %v265_v3 = vld [vmem:[%s253_s30] sm:$0xf]  ;;  %339 = vst.msk [vmem:[#allocation2 + $0x79] sm:$0x1] %vm321_vm2, %v1157_v10  ;;  %340 = vst.msk [vmem:[#allocation2 + $0x89] sm:$0x1] %vm321_vm2, %v1157_v10  ;;  %s263_s27 = scalar_lea.vmem %s1451_s6, %s1453_s22 }
  0x11   : > { %v266_v4 = vunpack.c.l.bf16 %v265_v3  ;;  %331 = vst.msk [vmem:[#allocation2 + $0x90] sm:$0x1] %vm321_vm2, %v1157_v10  ;;  %341 = vst.msk [vmem:[#allocation2 + $0x99] sm:$0x1] %vm321_vm2, %v1157_v10  ;;  %vm742_vm10 = vcmask 523264   ;;  %vm756_vm11 = vcmask 588800  }
  0x12   : > { %vm813_vm12 = vcmask 519168  }
  0x18   : > { %v407_v56 = vld [vmem:[#allocation2 + $0x90] sm:$0xff] }
  0x19   : > { %v423_v60 = vld [vmem:[#allocation2 + $0x92] sm:$0xff] }
  0x86   : > { %v271_v5 = vpop.permute.xlu0 %270 }
  0x87   : > { %v273_v6 = vmul.f32 %v271_v5, %v266_v4 }
  0x8a   : > { %v278_v7 = vpop.permute.xlu0 %277 }
  0x8b   : > { %v280_v8 = vadd.f32 %v278_v7, %v273_v6 }
  0x8d   : > { %v281_v9 = vmax.f32 %v280_v8, 0.0  ;;  %v415_v8 = vld [vmem:[#allocation2 + $0x91] sm:$0xff] }
  0x8f   : > { %282 = vxpose.xlu1.b32.start.end [1/1] (short) (narrow) %v281_v9, 64 }
 0x10f   : > { %v298_v11 = vpop.trf.xlu1 }
 0x110   : > { %343 = vst.msk [vmem:[#allocation2 + $0x11] sm:$0xff] %vm314_vm0, %v298_v11 }
 0x113   : > { %v299_v12 = vpop.trf.xlu1 }
 0x114   : > { %344 = vst.msk [vmem:[#allocation2 + $0x21] sm:$0xff] %vm314_vm0, %v299_v12 }
 0x117   : > { %v300_v15 = vpop.trf.xlu1  ;;  %v368_v16 = vld [vmem:[#allocation2 + $0x12] sm:$0xff] }
 0x118   : > { %v360_v17 = vld [vmem:[#allocation2 + $0x11] sm:$0xff]  ;;  %345 = vst.msk [vmem:[#allocation2 + $0x31] sm:$0xff] %vm314_vm0, %v300_v15  ;;  %v993_v18 = vpack.i.bf16 %v368_v16, %v367_v13 }
 0x119   : > { %v988_v19 = vpack.i.bf16 %v360_v17, %v359_v14  ;;  %v1276_v20 = vld [vmem:[#allocation2 + $0x10] sm:$0xff] }
 0x11a   : > { %994 = vrot.lane.b32.xlu0 %v993_v18, %s1158_s7  ;;  %v351_v18 = vld [vmem:[#allocation2] sm:$0xff] }
 0x11b   : > { %989 = vrot.lane.b32.xlu1 %v988_v19, %s1159_s8  ;;  %v1278_v21 = vld [vmem:[#allocation2 + $0x20] sm:$0xff]  ;;  %v301_v22 = vpop.trf.xlu1 }
 0x11c   : > { %v998_v23 = vpack.i.bf16 %v1278_v21, %v1276_v20  ;;  %346 = vst.msk [vmem:[#allocation2 + $0x41] sm:$0xff] %vm314_vm0, %v301_v22  ;;  %v384_v24 = vld [vmem:[#allocation2 + $0x21] sm:$0xff] }
 0x11d   : > { %v1003_v26 = vpack.i.bf16 %v384_v24, %v360_v17  ;;  %v392_v27 = vld [vmem:[#allocation2 + $0x22] sm:$0xff] }
 0x11e   : > { %999 = vrot.lane.b32.xlu0 %v998_v23, %s1160_s9  ;;  %v1008_v29 = vpack.i.bf16 %v392_v27, %v368_v16 }
 0x11f   : > { %v302_v25 = vpop.trf.xlu1  ;;  %v1287_v30 = vld [vmem:[#allocation2 + $0x30] sm:$0xff] }
 0x120   : > { %347 = vst.msk [vmem:[#allocation2 + $0x51] sm:$0xff] %vm314_vm0, %v302_v25  ;;  %v1013_v34 = vpack.i.bf16 %v1287_v30, %v1278_v21  ;;  %v409_v36 = vld [vmem:[#allocation2 + $0x31] sm:$0xff] }
 0x121   : > { %v1018_v39 = vpack.i.bf16 %v409_v36, %v384_v24  ;;  %v417_v40 = vld [vmem:[#allocation2 + $0x32] sm:$0xff] }
 0x122   : > { %1004 = vrot.lane.b32.xlu0 %v1003_v26, %s1161_s10  ;;  %v1023_v44 = vpack.i.bf16 %v417_v40, %v392_v27 }
 0x123   : > { %v303_v28 = vpop.trf.xlu1  ;;  %v418_v31 = vld [vmem:[#allocation2 + $0x42] sm:$0xff] }
 0x124   : > { %348 = vst.msk [vmem:[#allocation2 + $0x61] sm:$0xff] %vm314_vm0, %v303_v28  ;;  %v1311_v50 = vld [vmem:[#allocation2 + $0x40] sm:$0xff]  ;;  %v1048_v61 = vpack.i.bf16 %v418_v31, %v417_v40 }
 0x125   : > { %v1038_v52 = vpack.i.bf16 %v1311_v50, %v1287_v30  ;;  %v386_v53 = vld [vmem:[#allocation2 + $0x41] sm:$0xff] }
 0x126   : > { %1009 = vrot.lane.b32.xlu0 %v1008_v29, %s1162_s11  ;;  %v1043_v57 = vpack.i.bf16 %v386_v53, %v409_v36 }
 0x127   : > { %v1290_v32 = vld [vmem:[#allocation2 + $0x52] sm:$0xff]  ;;  %v304_v33 = vpop.trf.xlu1 }
 0x128   : > { %v1063_v35 = vpack.i.bf16 %v1290_v32, %v418_v31  ;;  %349 = vst.msk [vmem:[#allocation2 + $0x71] sm:$0xff] %vm314_vm0, %v304_v33  ;;  %v387_v41 = vld [vmem:[#allocation2 + $0x51] sm:$0xff] }
 0x129   : > { %v1321_v62 = vld [vmem:[#allocation2 + $0x50] sm:$0xff]  ;;  %v1058_v2 = vpack.i.bf16 %v387_v41, %v386_v53 }
 0x12a   : > { %1014 = vrot.lane.b32.xlu0 %v1013_v34, %s1163_s12  ;;  %1064 = vrot.lane.b32.xlu1 %v1063_v35, %s1164_s13  ;;  %v1053_v1 = vpack.i.bf16 %v1321_v62, %v1311_v50 }
 0x12b   : > { %v388_v37 = vld [vmem:[#allocation2 + $0x61] sm:$0xff]  ;;  %v305_v38 = vpop.trf.xlu1 }
 0x12c   : > { %350 = vst.msk [vmem:[#allocation2 + $0x81] sm:$0xff] %vm314_vm0, %v305_v38  ;;  %v1083_v42 = vpack.i.bf16 %v388_v37, %v387_v41  ;;  %v1303_v45 = vld [vmem:[#allocation2 + $0x60] sm:$0xff] }
 0x12d   : > { %v420_v48 = vld [vmem:[#allocation2 + $0x62] sm:$0xff]  ;;  %v1078_v3 = vpack.i.bf16 %v1303_v45, %v1321_v62 }
 0x12e   : > { %1019 = vrot.lane.b32.xlu0 %v1018_v39, %s1165_s14  ;;  %1074 = vrot.lane.b32.xlu1 %v1063_v35, %s1158_s7  ;;  %v1088_v4 = vpack.i.bf16 %v420_v48, %v1290_v32 }
 0x12f   : > { %v1301_v43 = vld [vmem:[#allocation2 + $0x70] sm:$0xff] }
 0x130   : > { %v1093_v46 = vpack.i.bf16 %v1301_v43, %v1303_v45  ;;  %v421_v47 = vld [vmem:[#allocation2 + $0x72] sm:$0xff] }
 0x131   : > { %v1103_v49 = vpack.i.bf16 %v421_v47, %v420_v48  ;;  %v389_v54 = vld [vmem:[#allocation2 + $0x71] sm:$0xff] }
 0x132   : > { %1024 = vrot.lane.b32.xlu0 %v1023_v44, %s1164_s13  ;;  %1084 = vrot.lane.b32.xlu1 %v1083_v42, %s1161_s10  ;;  %v1098_v5 = vpack.i.bf16 %v389_v54, %v388_v37 }
 0x133   : > { %v390_v51 = vld [vmem:[#allocation2 + $0x81] sm:$0xff] }
 0x134   : > { %v1123_v55 = vpack.i.bf16 %v390_v51, %v389_v54  ;;  %v406_v58 = vld [vmem:[#allocation2 + $0x80] sm:$0xff]  ;;  %v1138_v9 = vpack.i.bf16 %v415_v8, %v390_v51 }
 0x135   : > { %v1133_v59 = vpack.i.bf16 %v407_v56, %v406_v58  ;;  %v422_v63 = vld [vmem:[#allocation2 + $0x82] sm:$0xff]  ;;  %v1118_v6 = vpack.i.bf16 %v406_v58, %v1301_v43 }
 0x136   : > { %1029 = vrot.lane.b32.xlu0 %v1018_v39, %s1159_s8  ;;  %1094 = vrot.lane.b32.xlu1 %v1093_v46, %s1163_s12  ;;  %v1143_v0 = vpack.i.bf16 %v423_v60, %v422_v63  ;;  %v1128_v7 = vpack.i.bf16 %v422_v63, %v421_v47 }
 0x13a   : > { %1034 = vrot.lane.b32.xlu0 %v1023_v44, %s1158_s7  ;;  %1104 = vrot.lane.b32.xlu1 %v1103_v49, %s1164_s13 }
 0x13e   : > { %1039 = vrot.lane.b32.xlu0 %v1038_v52, %s1160_s9  ;;  %1114 = vrot.lane.b32.xlu1 %v1103_v49, %s1158_s7 }
 0x142   : > { %1044 = vrot.lane.b32.xlu0 %v1043_v57, %s1161_s10  ;;  %1124 = vrot.lane.b32.xlu1 %v1123_v55, %s1161_s10 }
 0x146   : > { %1049 = vrot.lane.b32.xlu0 %v1048_v61, %s1162_s11  ;;  %1134 = vrot.lane.b32.xlu1 %v1133_v59, %s1163_s12 }
 0x14a   : > { %1054 = vrot.lane.b32.xlu0 %v1053_v1, %s1163_s12  ;;  %1144 = vrot.lane.b32.xlu1 %v1143_v0, %s1164_s13 }
 0x14e   : > { %1059 = vrot.lane.b32.xlu0 %v1058_v2, %s1165_s14 }
 0x152   : > { %1069 = vrot.lane.b32.xlu0 %v1058_v2, %s1159_s8 }
 0x156   : > { %1079 = vrot.lane.b32.xlu0 %v1078_v3, %s1160_s9 }
 0x15a   : > { %1089 = vrot.lane.b32.xlu0 %v1088_v4, %s1162_s11 }
 0x15e   : > { %1099 = vrot.lane.b32.xlu0 %v1098_v5, %s1165_s14 }
 0x162   : > { %1109 = vrot.lane.b32.xlu0 %v1098_v5, %s1159_s8 }
 0x166   : > { %1119 = vrot.lane.b32.xlu0 %v1118_v6, %s1160_s9 }
 0x16a   : > { %1129 = vrot.lane.b32.xlu0 %v1128_v7, %s1162_s11 }
 0x16e   : > { %1139 = vrot.lane.b32.xlu0 %v1138_v9, %s1165_s14 }
 0x18c   : > { %v995_v11 = vpop.permute.xlu0 %994 }
 0x18d   : > { %v990_v14 = vpop.permute.xlu1 %989  ;;  %v997_v22 = vunpack.i.h.bf16 %v995_v11  ;;  %v996_v23 = vunpack.i.l.bf16 %v995_v11 }
 0x18e   : > { %v992_v16 = vunpack.i.h.bf16 %v990_v14  ;;  %v991_v17 = vunpack.i.l.bf16 %v990_v14 }
 0x190   : > { %v1000_v12 = vpop.permute.xlu0 %999  ;;  %v681_v24 = vsel %vm314_vm0, %v1276_v20, %v992_v16  ;;  %v680_v25 = vsel %vm314_vm0, %v351_v18, %v991_v17 }
 0x191   : > { %v1002_v26 = vunpack.i.h.bf16 %v1000_v12  ;;  %v1001_v27 = vunpack.i.l.bf16 %v1000_v12  ;;  %v689_v34 = vsel %vm688_vm4, %v680_v25, %v996_v23  ;;  %v690_v35 = vsel %vm688_vm4, %v681_v24, %v997_v22 }
 0x193   : > { %v698_v20 = vsel %vm697_vm5, %v689_v34, %v1001_v27  ;;  %v699_v38 = vsel %vm697_vm5, %v690_v35, %v1002_v26 }
 0x194   : > { %v1005_v13 = vpop.permute.xlu0 %1004 }
 0x195   : > { %v1007_v28 = vunpack.i.h.bf16 %v1005_v13  ;;  %v1006_v29 = vunpack.i.l.bf16 %v1005_v13 }
 0x197   : > { %v707_v41 = vsel %vm706_vm6, %v698_v20, %v1006_v29  ;;  %v708_v42 = vsel %vm706_vm6, %v699_v38, %v1007_v28 }
 0x198   : > { %v1010_v15 = vpop.permute.xlu0 %1009 }
 0x199   : > { %v1012_v31 = vunpack.i.h.bf16 %v1010_v15  ;;  %v1011_v32 = vunpack.i.l.bf16 %v1010_v15 }
 0x19b   : > { %v716_v44 = vsel %vm715_vm7, %v707_v41, %v1011_v32  ;;  %v717_v46 = vsel %vm715_vm7, %v708_v42, %v1012_v31 }
 0x19c   : > { %v1015_v19 = vpop.permute.xlu0 %1014  ;;  %v1065_v63 = vpop.permute.xlu1 %1064 }
 0x19d   : > { %v1017_v36 = vunpack.i.h.bf16 %v1015_v19  ;;  %v1016_v37 = vunpack.i.l.bf16 %v1015_v19  ;;  %v1067_v32 = vunpack.i.h.bf16 %v1065_v63 }
 0x19f   : > { %v725_v48 = vsel %vm724_vm8, %v716_v44, %v1016_v37  ;;  %v726_v49 = vsel %vm724_vm8, %v717_v46, %v1017_v36 }
 0x1a0   : > { %v1020_v33 = vpop.permute.xlu0 %1019  ;;  %v1075_v4 = vpop.permute.xlu1 %1074 }
 0x1a1   : > { %v1022_v39 = vunpack.i.h.bf16 %v1020_v33  ;;  %v1021_v40 = vunpack.i.l.bf16 %v1020_v33  ;;  %v1066_v33 = vunpack.i.l.bf16 %v1065_v63 }
 0x1a3   : > { %v734_v53 = vsel %vm733_vm9, %v725_v48, %v1021_v40  ;;  %v735_v54 = vsel %vm733_vm9, %v726_v49, %v1022_v39  ;;  %v1077_v49 = vunpack.i.h.bf16 %v1075_v4 }
 0x1a4   : > { %v1025_v47 = vpop.permute.xlu0 %1024  ;;  %v1085_v17 = vpop.permute.xlu1 %1084 }
 0x1a5   : > { %v1027_v51 = vunpack.i.h.bf16 %v1025_v47  ;;  %v1026_v52 = vunpack.i.l.bf16 %v1025_v47 }
 0x1a7   : > { %v743_v55 = vsel %vm742_vm10, %v734_v53, %v1026_v52  ;;  %v744_v56 = vsel %vm742_vm10, %v735_v54, %v1027_v51  ;;  %v1076_v51 = vunpack.i.l.bf16 %v1075_v4 }
 0x1a8   : > { %v1030_v57 = vpop.permute.xlu0 %1029  ;;  %v751_v58 = vpack.c.bf16 %v744_v56, %v743_v55  ;;  %v1095_v20 = vpop.permute.xlu1 %1094 }
 0x1a9   : > { %v1032_v2 = vunpack.i.h.bf16 %v1030_v57  ;;  %v1031_v3 = vunpack.i.l.bf16 %v1030_v57 }
 0x1aa   : > { %v761_v59 = vsel %vm756_vm11, %v751_v58, 0 }
 0x1ab   : > { %957 = vmatpush3.bf16.xpose.msra.mxu0 %v761_v59  ;;  %v682_v13 = vsel %vm314_vm0, %v1278_v21, %v1031_v3  ;;  %v683_v14 = vsel %vm314_vm0, %v1287_v30, %v1032_v2  ;;  %v1086_v59 = vunpack.i.l.bf16 %v1085_v17 }
 0x1ac   : > { %v1035_v60 = vpop.permute.xlu0 %1034  ;;  %958 = vmatprep.subr.bf16.mxu0 %v1157_v10  ;;  %v1105_v53 = vpop.permute.xlu1 %1104 }
 0x1ad   : > { %v1037_v5 = vunpack.i.h.bf16 %v1035_v60  ;;  %v1036_v6 = vunpack.i.l.bf16 %v1035_v60 }
 0x1af   : > { %v691_v18 = vsel %vm688_vm4, %v682_v13, %v1036_v6  ;;  %v692_v19 = vsel %vm688_vm4, %v683_v14, %v1037_v5  ;;  %v1097_v5 = vunpack.i.h.bf16 %v1095_v20  ;;  %v1096_v6 = vunpack.i.l.bf16 %v1095_v20 }
 0x1b0   : > { %v1040_v61 = vpop.permute.xlu0 %1039  ;;  %v1115_v2 = vpop.permute.xlu1 %1114 }
 0x1b1   : > { %v1042_v7 = vunpack.i.h.bf16 %v1040_v61  ;;  %v1041_v8 = vunpack.i.l.bf16 %v1040_v61 }
 0x1b3   : > { %v701_v24 = vsel %vm697_vm5, %v692_v19, %v1042_v7  ;;  %v700_v25 = vsel %vm697_vm5, %v691_v18, %v1041_v8 }
 0x1b4   : > { %v1045_v0 = vpop.permute.xlu0 %1044 }
 0x1b5   : > { %v1047_v9 = vunpack.i.h.bf16 %v1045_v0  ;;  %v1046_v11 = vunpack.i.l.bf16 %v1045_v0 }
 0x1b7   : > { %v709_v26 = vsel %vm706_vm6, %v700_v25, %v1046_v11  ;;  %v710_v21 = vsel %vm706_vm6, %v701_v24, %v1047_v9  ;;  %v1107_v11 = vunpack.i.h.bf16 %v1105_v53 }
 0x1b8   : > { %v1050_v1 = vpop.permute.xlu0 %1049 }
 0x1b9   : > { %v1052_v15 = vunpack.i.h.bf16 %v1050_v1  ;;  %v1051_v16 = vunpack.i.l.bf16 %v1050_v1 }
 0x1bb   : > { %v718_v30 = vsel %vm715_vm7, %v709_v26, %v1051_v16  ;;  %v719_v28 = vsel %vm715_vm7, %v710_v21, %v1052_v15 }
 0x1bc   : > { %v1055_v12 = vpop.permute.xlu0 %1054 }
 0x1bd   : > { %v1057_v22 = vunpack.i.h.bf16 %v1055_v12  ;;  %v1056_v23 = vunpack.i.l.bf16 %v1055_v12  ;;  %v1106_v12 = vunpack.i.l.bf16 %v1105_v53 }
 0x1bf   : > { %v728_v34 = vsel %vm724_vm8, %v719_v28, %v1057_v22  ;;  %v727_v35 = vsel %vm724_vm8, %v718_v30, %v1056_v23  ;;  %v1125_v22 = vpop.permute.xlu1 %1124  ;;  %v1117_v30 = vunpack.i.h.bf16 %v1115_v2  ;;  %v1116_v28 = vunpack.i.l.bf16 %v1115_v2 }
 0x1c0   : > { %v1060_v27 = vpop.permute.xlu0 %1059 }
 0x1c1   : > { %v1062_v29 = vunpack.i.h.bf16 %v1060_v27  ;;  %v1061_v31 = vunpack.i.l.bf16 %v1060_v27 }
 0x1c3   : > { %v736_v36 = vsel %vm733_vm9, %v727_v35, %v1061_v31  ;;  %v737_v37 = vsel %vm733_vm9, %v728_v34, %v1062_v29  ;;  %v1135_v31 = vpop.permute.xlu1 %1134 }
 0x1c4   : > { %v1070_v38 = vpop.permute.xlu0 %1069  ;;  %v745_v39 = vsel %vm742_vm10, %v736_v36, %v1066_v33  ;;  %v746_v40 = vsel %vm742_vm10, %v737_v37, %v1067_v32  ;;  %v1126_v37 = vunpack.i.l.bf16 %v1125_v22 }
 0x1c5   : > { %v1072_v41 = vunpack.i.h.bf16 %v1070_v38  ;;  %v1071_v42 = vunpack.i.l.bf16 %v1070_v38  ;;  %v752_v44 = vpack.c.bf16 %v746_v40, %v745_v39 }
 0x1c7   : > { %v684_v46 = vsel %vm314_vm0, %v1311_v50, %v1071_v42  ;;  %v685_v47 = vsel %vm314_vm0, %v1321_v62, %v1072_v41  ;;  %v764_v48 = vsel %vm756_vm11, %v752_v44, 0  ;;  %v1087_v62 = vunpack.i.h.bf16 %v1085_v17  ;;  %v1145_v42 = vpop.permute.xlu1 %1144 }
 0x1c8   : > { %v1080_v52 = vpop.permute.xlu0 %1079  ;;  %959 = vmatpush3.bf16.xpose.msra.mxu0 %v764_v48  ;;  %v693_v56 = vsel %vm688_vm4, %v684_v46, %v1076_v51  ;;  %v694_v57 = vsel %vm688_vm4, %v685_v47, %v1077_v49  ;;  %v1137_v46 = vunpack.i.h.bf16 %v1135_v31  ;;  %v1136_v47 = vunpack.i.l.bf16 %v1135_v31 }
 0x1c9   : > { %v1082_v54 = vunpack.i.h.bf16 %v1080_v52  ;;  %v1081_v55 = vunpack.i.l.bf16 %v1080_v52  ;;  %960 = vmatprep.subr.bf16.mxu0 %v1157_v10  ;;  %v1147_v52 = vunpack.i.h.bf16 %v1145_v42  ;;  %v1146_v53 = vunpack.i.l.bf16 %v1145_v42 }
 0x1cb   : > { %v702_v50 = vsel %vm697_vm5, %v693_v56, %v1081_v55  ;;  %v703_v58 = vsel %vm697_vm5, %v694_v57, %v1082_v54 }
 0x1cc   : > { %v1090_v60 = vpop.permute.xlu0 %1089  ;;  %v711_v0 = vsel %vm706_vm6, %v702_v50, %v1086_v59  ;;  %v712_v1 = vsel %vm706_vm6, %v703_v58, %v1087_v62 }
 0x1cd   : > { %v1092_v61 = vunpack.i.h.bf16 %v1090_v60  ;;  %v1091_v63 = vunpack.i.l.bf16 %v1090_v60  ;;  %v755_v60 = vld [vmem:[%s1446_s1] sm:$0xf] }
 0x1cf   : > { %v720_v3 = vsel %vm715_vm7, %v711_v0, %v1091_v63  ;;  %v721_v4 = vsel %vm715_vm7, %v712_v1, %v1092_v61 }
 0x1d0   : > { %v1100_v7 = vpop.permute.xlu0 %1099  ;;  %v729_v13 = vsel %vm724_vm8, %v720_v3, %v1096_v6  ;;  %v730_v14 = vsel %vm724_vm8, %v721_v4, %v1097_v5  ;;  %v819_v6 = vlaneseq }
 0x1d1   : > { %v1102_v8 = vunpack.i.h.bf16 %v1100_v7  ;;  %v1101_v9 = vunpack.i.l.bf16 %v1100_v7 }
 0x1d2   : > { %v820_v7 = vand.u32 127, %v819_v6 }
 0x1d3   : > { %v738_v15 = vsel %vm733_vm9, %v729_v13, %v1101_v9  ;;  %v739_v16 = vsel %vm733_vm9, %v730_v14, %v1102_v8  ;;  %v822_v8 = vshrl.u32 %v819_v6, 7 }
 0x1d4   : > { %v1110_v17 = vpop.permute.xlu0 %1109  ;;  %v747_v18 = vsel %vm742_vm10, %v738_v15, %v1106_v12  ;;  %v748_v19 = vsel %vm742_vm10, %v739_v16, %v1107_v11 }
 0x1d5   : > { %v1112_v23 = vunpack.i.h.bf16 %v1110_v17  ;;  %v1111_v24 = vunpack.i.l.bf16 %v1110_v17  ;;  %v753_v25 = vpack.c.bf16 %v748_v19, %v747_v18  ;;  %v823_v9 = vsub.s32 %v820_v7, %v822_v8 }
 0x1d7   : > { %v686_v26 = vsel %vm314_vm0, %v1303_v45, %v1111_v24  ;;  %v687_v21 = vsel %vm314_vm0, %v1301_v43, %v1112_v23  ;;  %v767_v27 = vsel %vm756_vm11, %v753_v25, 0  ;;  %v1127_v43 = vunpack.i.h.bf16 %v1125_v22 }
 0x1d8   : > { %v1120_v29 = vpop.permute.xlu0 %1119  ;;  %961 = vmatpush3.bf16.xpose.msra.mxu0 %v767_v27  ;;  %v695_v34 = vsel %vm688_vm4, %v686_v26, %v1116_v28  ;;  %v696_v35 = vsel %vm688_vm4, %v687_v21, %v1117_v30 }
 0x1d9   : > { %v1122_v32 = vunpack.i.h.bf16 %v1120_v29  ;;  %v1121_v33 = vunpack.i.l.bf16 %v1120_v29  ;;  %962 = vmatprep.subr.bf16.mxu0 %v1157_v10 }
 0x1db   : > { %v704_v45 = vsel %vm697_vm5, %v695_v34, %v1121_v33  ;;  %v705_v36 = vsel %vm697_vm5, %v696_v35, %v1122_v32 }
 0x1dc   : > { %v1130_v20 = vpop.permute.xlu0 %1129  ;;  %v713_v40 = vsel %vm706_vm6, %v704_v45, %v1126_v37  ;;  %v714_v41 = vsel %vm706_vm6, %v705_v36, %v1127_v43 }
 0x1dd   : > { %v1132_v38 = vunpack.i.h.bf16 %v1130_v20  ;;  %v1131_v39 = vunpack.i.l.bf16 %v1130_v20 }
 0x1df   : > { %v722_v10 = vsel %vm715_vm7, %v713_v40, %v1131_v39  ;;  %v723_v44 = vsel %vm715_vm7, %v714_v41, %v1132_v38 }
 0x1e0   : > { %v1140_v48 = vpop.permute.xlu0 %1139  ;;  %v731_v54 = vsel %vm724_vm8, %v722_v10, %v1136_v47  ;;  %v732_v55 = vsel %vm724_vm8, %v723_v44, %v1137_v46 }
 0x1e1   : > { %v1142_v49 = vunpack.i.h.bf16 %v1140_v48  ;;  %v1141_v51 = vunpack.i.l.bf16 %v1140_v48 }
 0x1e3   : > { %v740_v56 = vsel %vm733_vm9, %v731_v54, %v1141_v51  ;;  %v741_v57 = vsel %vm733_vm9, %v732_v55, %v1142_v49 }
 0x1e4   : > { %v749_v50 = vsel %vm742_vm10, %v740_v56, %v1146_v53  ;;  %v750_v58 = vsel %vm742_vm10, %v741_v57, %v1147_v52 }
 0x1e5   : > { %v754_v62 = vpack.c.bf16 %v750_v58, %v749_v50 }
 0x1e7   : > { %v770_v59 = vsel %vm756_vm11, %v754_v62, 0 }
 0x1e8   : > { %963 = vmatpush3.bf16.xpose.msra.mxu0 %v770_v59 }
 0x1ef   : > { %965 = vmatmul.mubr.msk.bf16.vlgmr.msra.gmra.mrb[0].mxu0 %vm756_vm11, %v755_v60 }
 0x2c2   : > { %v806_v61 = vpop.f32.mrb[0].mxu0 }
 0x2c3   : > { %v812_v63 = vpack.c.bf16 %v806_v61, %v806_v61  ;;  %v966_v0 = vpop.f32.mrb[1].mxu0  ;;  %v815_v1 = vsel %vm742_vm10, %v806_v61, 0.0  ;;  %v827_v2 = vmul.f32 %v806_v61, %v806_v61 }
 0x2c4   : > { %816 = vadd.xlane.f32.xlu0 %v815_v1  ;;  %v809_v3 = vpop.f32.mrb[2].mxu0 }
 0x2c5   : > { %814 = vst.msk [vmem:[%s257_s19] sm:$0xf] %vm813_vm12, %v812_v63  ;;  %v967_v4 = vpop.f32.mrb[3].mxu0  ;;  %v828_v5 = vsel %vm742_vm10, %v827_v2, 0.0 }
 0x2c6   : > { %829 = vadd.xlane.f32.xlu1 %v828_v5 }
 0x351   : > { %v817_v11 = vpop.xlane.xlu0 %816 }
 0x352   : > { %v824_v12 = vrot.slane %v817_v11, %v823_v9 }
 0x353   : > { %v830_v13 = vpop.xlane.xlu1 %829 }
 0x354   : > { %826 = vst.msk [vmem:[%s260_s24] sm:$0x1] %vm321_vm2, %v824_v12  ;;  %v835_v14 = vrot.slane %v830_v13, %v823_v9 }
 0x356   : > { %837 = vst.msk [vmem:[%s263_s27] sm:$0x1] %vm321_vm2, %v835_v14 }
 0x357 PF: > { %s17_s21 = sadd.s32 1, %s1154_s21  }
 0x358   : > { %p14_p4 = scmp.ge.s32.totalorder %s17_s21, 4  }
 0x35a   :  { %16 = sbr.rel (!%p14_p4) target bundleno = 1 (0x1), region = 93 }

// kernel: down_forward.3
= control target key start
LH: loop header
LB: loop body
LE: loop exit
PB: predicated region body
PF: predicated region fallthrough
CT: control target
= control target key end

     0   :  { %s1159_s15 = smov 0   ;;  %s1395_s0 = inlined_call_operand.vmem [shape: f32[2,8,2,8,8], index: 0, kind: input, shape index: {}]   ;;  %s1396_s1 = inlined_call_operand.vmem [shape: bf16[8,36], index: 1, kind: input, shape index: {}]   ;;  %s1397_s2 = inlined_call_operand.vmem [shape: bf16[2,8,64], index: 2, kind: output, shape index: {0}]   ;;  %s1398_s3 = inlined_call_operand.vmem [shape: f32[2,1,8], index: 3, kind: output, shape index: {1}]   ;;  %s1399_s4 = inlined_call_operand.vmem [shape: f32[2,1,8], index: 4, kind: output, shape index: {2}]  }
   0x1 LB: > { %s907_s16 = sadd.s32 4294967295, %s1121_s15   ;;  %p911_p0 = scmp.ge.s32.totalorder %s1121_s15, 1  ;;  %s1121_s15 = sphi %s1159_s15, %s15_s15  }
   0x2   : > { %p167_p1 = scmp.lt.s32.totalorder %s1121_s15, 3 }
   0x4   : > { %p168_p2 = pnand %p911_p0, %p167_p1 }
   0x5   : > { %p1169_p3 = scmp.lt.s32.totalorder (!%p168_p2), %s907_s16, 1  ;;  %vm278_vm0 = vcmask (!%p168_p2), 31744   ;;  %vm280_vm1 = vcmask (!%p168_p2), 25600   ;;  %vm285_vm2 = vcmask (!%p168_p2), 24576   ;;  %v1123_v0 = vmov (!%p168_p2), 0.0   ;;  %s1124_s22 = smov (!%p168_p2), 124  }
   0x6   : > { %171 = sbr.rel (%p168_p2) target bundleno = 696 (0x2b8), region = 28  ;;  %279 = vst.msk [vmem:[#allocation2] sm:$0xff] (!%p168_p2), %vm278_vm0, %v1123_v0  ;;  %283 = vst.msk [vmem:[#allocation2 + $0x90] sm:$0xff] (!%p168_p2), %vm278_vm0, %v1123_v0  ;;  %924 = vmatprep.subr.bf16.mxu0 (!%p168_p2), %v1123_v0  ;;  %s1125_s23 = smov (!%p168_p2), 8   ;;  %vm1133_vm3 = vmmov (!%p168_p2), 0   ;;  %vm652_vm4 = vcmask (!%p168_p2), 64512  }
   0x7   : > { %281 = vst.msk [vmem:[#allocation2 + $0x8] sm:$0x3] (!%p168_p2), %vm280_vm1, %v1123_v0  ;;  %284 = vst.msk [vmem:[#allocation2 + $0x98] sm:$0x3] (!%p168_p2), %vm280_vm1, %v1123_v0  ;;  %s1126_s24 = smov (!%p168_p2), 4   ;;  %s1127_s25 = smov (!%p168_p2), 16   ;;  %932 = vmatprep.mubr.msk.bf16.mxu0 (!%p168_p2), %vm1133_vm3, %v1123_v0 }
   0x8   : > { %297 = vst.msk [vmem:[#allocation2 + $0x19] sm:$0x1] (!%p168_p2), %vm285_vm2, %v1123_v0  ;;  %287 = vst.msk [vmem:[#allocation2 + $0x10] sm:$0x1] (!%p168_p2), %vm285_vm2, %v1123_v0  ;;  %s1128_s26 = smov (!%p168_p2), 12   ;;  %s1129_s27 = smov (!%p168_p2), 24  }
   0x9   : > { %288 = vst.msk [vmem:[#allocation2 + $0x20] sm:$0x1] (!%p168_p2), %vm285_vm2, %v1123_v0  ;;  %289 = vst.msk [vmem:[#allocation2 + $0x30] sm:$0x1] (!%p168_p2), %vm285_vm2, %v1123_v0  ;;  %s1130_s28 = smov (!%p168_p2), 20   ;;  %s1131_s29 = smov (!%p168_p2), 32  }
   0xa   : > { %290 = vst.msk [vmem:[#allocation2 + $0x40] sm:$0x1] (!%p168_p2), %vm285_vm2, %v1123_v0  ;;  %291 = vst.msk [vmem:[#allocation2 + $0x50] sm:$0x1] (!%p168_p2), %vm285_vm2, %v1123_v0  ;;  %s1132_s30 = smov (!%p168_p2), 28   ;;  %vm661_vm5 = vcmask (!%p168_p2), 97280  }
   0xb   : > { %292 = vst.msk [vmem:[#allocation2 + $0x60] sm:$0x1] (!%p168_p2), %vm285_vm2, %v1123_v0  ;;  %293 = vst.msk [vmem:[#allocation2 + $0x70] sm:$0x1] (!%p168_p2), %vm285_vm2, %v1123_v0  ;;  %vm670_vm6 = vcmask (!%p168_p2), 130048   ;;  %vm679_vm7 = vcmask (!%p168_p2), 162816  }
   0xc   : > { %294 = vst.msk [vmem:[#allocation2 + $0x80] sm:$0x1] (!%p168_p2), %vm285_vm2, %v1123_v0  ;;  %298 = vst.msk [vmem:[#allocation2 + $0x29] sm:$0x1] (!%p168_p2), %vm285_vm2, %v1123_v0  ;;  %vm688_vm8 = vcmask (!%p168_p2), 195584   ;;  %vm697_vm9 = vcmask (!%p168_p2), 228352  }
   0xd   : > { %299 = vst.msk [vmem:[#allocation2 + $0x39] sm:$0x1] %vm285_vm2, %v1123_v0  ;;  %300 = vst.msk [vmem:[#allocation2 + $0x49] sm:$0x1] %vm285_vm2, %v1123_v0  ;;  %s1402_s16 = smov (!%p1169_p3, %s907_s16), 1  ;;  %vm706_vm10 = vcmask 261120  }
   0xe   : > { %301 = vst.msk [vmem:[#allocation2 + $0x59] sm:$0x1] %vm285_vm2, %v1123_v0  ;;  %302 = vst.msk [vmem:[#allocation2 + $0x69] sm:$0x1] %vm285_vm2, %v1123_v0  ;;  %s918_s18 = sshll.u32 %s1402_s16, 7  ;;  %v323_v34 = vld [vmem:[#allocation2 + $0x1] sm:$0xff]  ;;  %s209_s13 = scalar_lea.vmem %s1398_s3, %s1402_s16 }
   0xf   : > { %303 = vst.msk [vmem:[#allocation2 + $0x79] sm:$0x1] %vm285_vm2, %v1123_v0  ;;  %304 = vst.msk [vmem:[#allocation2 + $0x89] sm:$0x1] %vm285_vm2, %v1123_v0  ;;  %s202_s21 = scalar_lea.vmem %s1395_s0, %s918_s18  ;;  %vm720_vm11 = vcmask 293888   ;;  %s914_s7 = sshll.u32 %s1402_s16, 2 }
  0x10   : > { %296 = vst.msk [vmem:[#allocation2 + $0x9] sm:$0x1] %vm285_vm2, %v1123_v0  ;;  %286 = vst.msk [vmem:[#allocation2] sm:$0x1] %vm285_vm2, %v1123_v0  ;;  %v214_v1 = vld [vmem:[%s202_s21] sm:$0xff]  ;;  %v215_v2 = vld [vmem:[%s202_s21 + $0x8] sm:$0xff]  ;;  %s206_s10 = scalar_lea.vmem %s1397_s2, %s914_s7  ;;  %s212_s18 = scalar_lea.vmem %s1399_s4, %s1402_s16 }
  0x11   : > { %295 = vst.msk [vmem:[#allocation2 + $0x90] sm:$0x1] %vm285_vm2, %v1123_v0  ;;  %305 = vst.msk [vmem:[#allocation2 + $0x99] sm:$0x1] %vm285_vm2, %v1123_v0  ;;  %v218_v3 = vld [vmem:[%s202_s21 + $0x20] sm:$0xff]  ;;  %v230_v4 = vmax.f32 %v214_v1, %v215_v2  ;;  %v219_v5 = vld [vmem:[%s202_s21 + $0x28] sm:$0xff] }
  0x12   : > { %v216_v6 = vld [vmem:[%s202_s21 + $0x10] sm:$0xff]  ;;  %v217_v7 = vld [vmem:[%s202_s21 + $0x18] sm:$0xff]  ;;  %v232_v8 = vmax.f32 %v218_v3, %v219_v5  ;;  %v222_v13 = vld [vmem:[%s202_s21 + $0x40] sm:$0xff]  ;;  %vm779_vm12 = vcmask 523264   ;;  %vm777_vm13 = vcmask 519168   ;;  %vm791_vm14 = vcmask 57344  }
  0x13   : > { %v220_v9 = vld [vmem:[%s202_s21 + $0x30] sm:$0xff]  ;;  %v221_v10 = vld [vmem:[%s202_s21 + $0x38] sm:$0xff]  ;;  %246 = vrot.lane.b32.xlu0 %v230_v4, %s1124_s22  ;;  %v231_v11 = vmax.f32 %v216_v6, %v217_v7  ;;  %v223_v14 = vld [vmem:[%s202_s21 + $0x48] sm:$0xff] }
  0x14   : > { %250 = vrot.lane.b32.xlu1 %v232_v8, %s1124_s22  ;;  %v233_v12 = vmax.f32 %v220_v9, %v221_v10  ;;  %v224_v15 = vld [vmem:[%s202_s21 + $0x50] sm:$0xff]  ;;  %v225_v16 = vld [vmem:[%s202_s21 + $0x58] sm:$0xff]  ;;  %v234_v17 = vmax.f32 %v222_v13, %v223_v14  ;;  %v226_v19 = vld [vmem:[%s202_s21 + $0x60] sm:$0xff] }
  0x15   : > { %v235_v18 = vmax.f32 %v224_v15, %v225_v16  ;;  %v227_v20 = vld [vmem:[%s202_s21 + $0x68] sm:$0xff]  ;;  %v228_v21 = vld [vmem:[%s202_s21 + $0x70] sm:$0xff]  ;;  %v229_v22 = vld [vmem:[%s202_s21 + $0x78] sm:$0xff] }
  0x16   : > { %v236_v23 = vmax.f32 %v226_v19, %v227_v20  ;;  %v237_v24 = vmax.f32 %v228_v21, %v229_v22 }
  0x17   : > { %248 = vrot.lane.b32.xlu0 %v231_v11, %s1124_s22  ;;  %v331_v33 = vld [vmem:[#allocation2 + $0x2] sm:$0xff] }
  0x18   : > { %252 = vrot.lane.b32.xlu1 %v233_v12, %s1124_s22 }
  0x1b   : > { %254 = vrot.lane.b32.xlu0 %v234_v17, %s1124_s22 }
  0x1c   : > { %256 = vrot.lane.b32.xlu1 %v235_v18, %s1124_s22 }
  0x1f   : > { %258 = vrot.lane.b32.xlu0 %v236_v23, %s1124_s22 }
  0x20   : > { %260 = vrot.lane.b32.xlu1 %v237_v24, %s1124_s22 }
  0x85   : > { %v247_v25 = vpop.permute.xlu0 %246 }
  0x86   : > { %v270_v26 = vmax.f32 %v230_v4, %v247_v25  ;;  %v251_v27 = vpop.permute.xlu1 %250  ;;  %v371_v25 = vld [vmem:[#allocation2 + $0x90] sm:$0xff] }
  0x87   : > { %v272_v28 = vmax.f32 %v232_v8, %v251_v27 }
  0x88   : > { %307 = vst.msk [vmem:[#allocation2 + $0x11] sm:$0xff] %vm278_vm0, %v270_v26 }
  0x89   : > { %309 = vst.msk [vmem:[#allocation2 + $0x31] sm:$0xff] %vm278_vm0, %v272_v28  ;;  %v249_v29 = vpop.permute.xlu0 %248 }
  0x8a   : > { %v271_v30 = vmax.f32 %v231_v11, %v249_v29  ;;  %v253_v31 = vpop.permute.xlu1 %252  ;;  %v387_v29 = vld [vmem:[#allocation2 + $0x92] sm:$0xff] }
  0x8b   : > { %v273_v32 = vmax.f32 %v233_v12, %v253_v31 }
  0x8c   : > { %308 = vst.msk [vmem:[#allocation2 + $0x21] sm:$0xff] %vm278_vm0, %v271_v30  ;;  %v379_v30 = vld [vmem:[#allocation2 + $0x91] sm:$0xff] }
  0x8d   : > { %310 = vst.msk [vmem:[#allocation2 + $0x41] sm:$0xff] %vm278_vm0, %v273_v32  ;;  %v255_v35 = vpop.permute.xlu0 %254 }
  0x8e   : > { %v274_v36 = vmax.f32 %v234_v17, %v255_v35  ;;  %v257_v37 = vpop.permute.xlu1 %256 }
  0x8f   : > { %v332_v38 = vld [vmem:[#allocation2 + $0x12] sm:$0xff]  ;;  %v275_v40 = vmax.f32 %v235_v18, %v257_v37 }
  0x90   : > { %v324_v39 = vld [vmem:[#allocation2 + $0x11] sm:$0xff]  ;;  %v960_v41 = vpack.i.bf16 %v332_v38, %v331_v33  ;;  %311 = vst.msk [vmem:[#allocation2 + $0x51] sm:$0xff] %vm278_vm0, %v274_v36 }
  0x91   : > { %v955_v42 = vpack.i.bf16 %v324_v39, %v323_v34  ;;  %312 = vst.msk [vmem:[#allocation2 + $0x61] sm:$0xff] %vm278_vm0, %v275_v40  ;;  %v259_v43 = vpop.permute.xlu0 %258  ;;  %v1238_v47 = vld [vmem:[#allocation2 + $0x10] sm:$0xff]  ;;  %v315_v34 = vld [vmem:[#allocation2] sm:$0xff] }
  0x92   : > { %961 = vrot.lane.b32.xlu1 %v960_v41, %s1125_s23  ;;  %v276_v44 = vmax.f32 %v236_v23, %v259_v43  ;;  %v261_v45 = vpop.permute.xlu1 %260  ;;  %v1245_v52 = vld [vmem:[#allocation2 + $0x30] sm:$0xff] }
  0x93   : > { %956 = vrot.lane.b32.xlu0 %v955_v42, %s1126_s24  ;;  %v348_v46 = vld [vmem:[#allocation2 + $0x21] sm:$0xff]  ;;  %v277_v49 = vmax.f32 %v237_v24, %v261_v45  ;;  %v381_v56 = vld [vmem:[#allocation2 + $0x32] sm:$0xff] }
  0x94   : > { %v1240_v48 = vld [vmem:[#allocation2 + $0x20] sm:$0xff]  ;;  %v970_v50 = vpack.i.bf16 %v348_v46, %v324_v39  ;;  %313 = vst.msk [vmem:[#allocation2 + $0x71] sm:$0xff] %vm278_vm0, %v276_v44  ;;  %v373_v57 = vld [vmem:[#allocation2 + $0x31] sm:$0xff] }
  0x95   : > { %v965_v51 = vpack.i.bf16 %v1240_v48, %v1238_v47  ;;  %v356_v53 = vld [vmem:[#allocation2 + $0x22] sm:$0xff]  ;;  %314 = vst.msk [vmem:[#allocation2 + $0x81] sm:$0xff] %vm278_vm0, %v277_v49  ;;  %v980_v54 = vpack.i.bf16 %v1245_v52, %v1240_v48  ;;  %v985_v59 = vpack.i.bf16 %v373_v57, %v348_v46 }
  0x96   : > { %971 = vrot.lane.b32.xlu1 %v970_v50, %s1127_s25  ;;  %v975_v55 = vpack.i.bf16 %v356_v53, %v332_v38  ;;  %v990_v58 = vpack.i.bf16 %v381_v56, %v356_v53  ;;  %v350_v60 = vld [vmem:[#allocation2 + $0x41] sm:$0xff] }
  0x97   : > { %966 = vrot.lane.b32.xlu0 %v965_v51, %s1128_s26  ;;  %v1256_v61 = vld [vmem:[#allocation2 + $0x40] sm:$0xff]  ;;  %v1010_v62 = vpack.i.bf16 %v350_v60, %v373_v57  ;;  %v1262_v2 = vld [vmem:[#allocation2 + $0x50] sm:$0xff] }
  0x98   : > { %v1005_v63 = vpack.i.bf16 %v1256_v61, %v1245_v52  ;;  %v358_v1 = vld [vmem:[#allocation2 + $0x42] sm:$0xff]  ;;  %v1020_v4 = vpack.i.bf16 %v1262_v2, %v1256_v61  ;;  %v375_v5 = vld [vmem:[#allocation2 + $0x51] sm:$0xff] }
  0x99   : > { %v1015_v3 = vpack.i.bf16 %v358_v1, %v381_v56  ;;  %v383_v6 = vld [vmem:[#allocation2 + $0x52] sm:$0xff]  ;;  %v1025_v7 = vpack.i.bf16 %v375_v5, %v350_v60  ;;  %v352_v9 = vld [vmem:[#allocation2 + $0x61] sm:$0xff] }
  0x9a   : > { %981 = vrot.lane.b32.xlu1 %v980_v54, %s1129_s27  ;;  %v1030_v8 = vpack.i.bf16 %v383_v6, %v358_v1  ;;  %v1272_v10 = vld [vmem:[#allocation2 + $0x60] sm:$0xff]  ;;  %v1050_v11 = vpack.i.bf16 %v352_v9, %v375_v5 }
  0x9b   : > { %976 = vrot.lane.b32.xlu0 %v975_v55, %s1130_s28  ;;  %v1045_v12 = vpack.i.bf16 %v1272_v10, %v1262_v2  ;;  %v360_v13 = vld [vmem:[#allocation2 + $0x62] sm:$0xff]  ;;  %v1278_v14 = vld [vmem:[#allocation2 + $0x70] sm:$0xff] }
  0x9c   : > { %v1055_v15 = vpack.i.bf16 %v360_v13, %v383_v6  ;;  %v1060_v16 = vpack.i.bf16 %v1278_v14, %v1272_v10  ;;  %v377_v17 = vld [vmem:[#allocation2 + $0x71] sm:$0xff]  ;;  %v354_v21 = vld [vmem:[#allocation2 + $0x81] sm:$0xff] }
  0x9d   : > { %v385_v18 = vld [vmem:[#allocation2 + $0x72] sm:$0xff]  ;;  %v1065_v19 = vpack.i.bf16 %v377_v17, %v352_v9  ;;  %v346_v22 = vld [vmem:[#allocation2 + $0x80] sm:$0xff]  ;;  %v1090_v23 = vpack.i.bf16 %v354_v21, %v377_v17  ;;  %v1105_v32 = vpack.i.bf16 %v379_v30, %v354_v21 }
  0x9e   : > { %991 = vrot.lane.b32.xlu1 %v990_v58, %s1131_s29  ;;  %v1070_v20 = vpack.i.bf16 %v385_v18, %v360_v13  ;;  %v1085_v24 = vpack.i.bf16 %v346_v22, %v1278_v14  ;;  %v362_v26 = vld [vmem:[#allocation2 + $0x82] sm:$0xff]  ;;  %v1100_v27 = vpack.i.bf16 %v371_v25, %v346_v22 }
  0x9f   : > { %986 = vrot.lane.b32.xlu0 %v985_v59, %s1132_s30  ;;  %v1095_v28 = vpack.i.bf16 %v362_v26, %v385_v18  ;;  %v1110_v31 = vpack.i.bf16 %v387_v29, %v362_v26 }
  0xa2   : > { %1001 = vrot.lane.b32.xlu1 %v990_v58, %s1125_s23 }
  0xa3   : > { %996 = vrot.lane.b32.xlu0 %v985_v59, %s1126_s24 }
  0xa6   : > { %1011 = vrot.lane.b32.xlu1 %v1010_v62, %s1127_s25 }
  0xa7   : > { %1006 = vrot.lane.b32.xlu0 %v1005_v63, %s1128_s26 }
  0xaa   : > { %1021 = vrot.lane.b32.xlu1 %v1020_v4, %s1129_s27 }
  0xab   : > { %1016 = vrot.lane.b32.xlu0 %v1015_v3, %s1130_s28 }
  0xae   : > { %1031 = vrot.lane.b32.xlu1 %v1030_v8, %s1131_s29 }
  0xaf   : > { %1026 = vrot.lane.b32.xlu0 %v1025_v7, %s1132_s30 }
  0xb2   : > { %1041 = vrot.lane.b32.xlu1 %v1030_v8, %s1125_s23 }
  0xb3   : > { %1036 = vrot.lane.b32.xlu0 %v1025_v7, %s1126_s24 }
  0xb6   : > { %1051 = vrot.lane.b32.xlu1 %v1050_v11, %s1127_s25 }
  0xb7   : > { %1046 = vrot.lane.b32.xlu0 %v1045_v12, %s1128_s26 }
  0xba   : > { %1061 = vrot.lane.b32.xlu1 %v1060_v16, %s1129_s27 }
  0xbb   : > { %1056 = vrot.lane.b32.xlu0 %v1055_v15, %s1130_s28 }
  0xbe   : > { %1071 = vrot.lane.b32.xlu1 %v1070_v20, %s1131_s29 }
  0xbf   : > { %1066 = vrot.lane.b32.xlu0 %v1065_v19, %s1132_s30 }
  0xc2   : > { %1081 = vrot.lane.b32.xlu1 %v1070_v20, %s1125_s23 }
  0xc3   : > { %1076 = vrot.lane.b32.xlu0 %v1065_v19, %s1126_s24 }
  0xc6   : > { %1091 = vrot.lane.b32.xlu1 %v1090_v23, %s1127_s25 }
  0xc7   : > { %1086 = vrot.lane.b32.xlu0 %v1085_v24, %s1128_s26 }
  0xca   : > { %1101 = vrot.lane.b32.xlu1 %v1100_v27, %s1129_s27 }
  0xcb   : > { %1096 = vrot.lane.b32.xlu0 %v1095_v28, %s1130_s28 }
  0xce   : > { %1111 = vrot.lane.b32.xlu1 %v1110_v31, %s1131_s29 }
  0xcf   : > { %1106 = vrot.lane.b32.xlu0 %v1105_v32, %s1132_s30 }
 0x104   : > { %v962_v33 = vpop.permute.xlu1 %961 }
 0x105   : > { %v957_v35 = vpop.permute.xlu0 %956  ;;  %v964_v38 = vunpack.i.h.bf16 %v962_v33  ;;  %v963_v39 = vunpack.i.l.bf16 %v962_v33 }
 0x106   : > { %v959_v36 = vunpack.i.h.bf16 %v957_v35  ;;  %v958_v37 = vunpack.i.l.bf16 %v957_v35 }
 0x108   : > { %v645_v40 = vsel %vm278_vm0, %v1238_v47, %v959_v36  ;;  %v644_v41 = vsel %vm278_vm0, %v315_v34, %v958_v37  ;;  %v972_v42 = vpop.permute.xlu1 %971 }
 0x109   : > { %v967_v43 = vpop.permute.xlu0 %966  ;;  %v974_v46 = vunpack.i.h.bf16 %v972_v42  ;;  %v973_v49 = vunpack.i.l.bf16 %v972_v42  ;;  %v653_v50 = vsel %vm652_vm4, %v644_v41, %v963_v39  ;;  %v654_v51 = vsel %vm652_vm4, %v645_v40, %v964_v38 }
 0x10a   : > { %v969_v44 = vunpack.i.h.bf16 %v967_v43  ;;  %v968_v45 = vunpack.i.l.bf16 %v967_v43 }
 0x10c   : > { %v662_v53 = vsel %vm661_vm5, %v653_v50, %v968_v45  ;;  %v663_v54 = vsel %vm661_vm5, %v654_v51, %v969_v44  ;;  %v982_v47 = vpop.permute.xlu1 %981 }
 0x10d   : > { %v977_v55 = vpop.permute.xlu0 %976  ;;  %v984_v58 = vunpack.i.h.bf16 %v982_v47  ;;  %v983_v59 = vunpack.i.l.bf16 %v982_v47  ;;  %v671_v60 = vsel %vm670_vm6, %v662_v53, %v973_v49  ;;  %v672_v62 = vsel %vm670_vm6, %v663_v54, %v974_v46 }
 0x10e   : > { %v979_v56 = vunpack.i.h.bf16 %v977_v55  ;;  %v978_v57 = vunpack.i.l.bf16 %v977_v55 }
 0x110   : > { %v680_v63 = vsel %vm679_vm7, %v671_v60, %v978_v57  ;;  %v681_v1 = vsel %vm679_vm7, %v672_v62, %v979_v56  ;;  %v992_v3 = vpop.permute.xlu1 %991 }
 0x111   : > { %v987_v4 = vpop.permute.xlu0 %986  ;;  %v994_v5 = vunpack.i.h.bf16 %v992_v3  ;;  %v993_v6 = vunpack.i.l.bf16 %v992_v3  ;;  %v689_v9 = vsel %vm688_vm8, %v680_v63, %v983_v59  ;;  %v690_v11 = vsel %vm688_vm8, %v681_v1, %v984_v58 }
 0x112   : > { %v989_v7 = vunpack.i.h.bf16 %v987_v4  ;;  %v988_v8 = vunpack.i.l.bf16 %v987_v4 }
 0x114   : > { %v698_v12 = vsel %vm697_vm9, %v689_v9, %v988_v8  ;;  %v699_v13 = vsel %vm697_vm9, %v690_v11, %v989_v7  ;;  %v1002_v15 = vpop.permute.xlu1 %1001 }
 0x115   : > { %v997_v16 = vpop.permute.xlu0 %996  ;;  %v707_v17 = vsel %vm706_vm10, %v698_v12, %v993_v6  ;;  %v708_v18 = vsel %vm706_vm10, %v699_v13, %v994_v5  ;;  %v1004_v21 = vunpack.i.h.bf16 %v1002_v15  ;;  %v1003_v22 = vunpack.i.l.bf16 %v1002_v15 }
 0x116   : > { %v999_v19 = vunpack.i.h.bf16 %v997_v16  ;;  %v998_v20 = vunpack.i.l.bf16 %v997_v16  ;;  %v715_v23 = vpack.c.bf16 %v708_v18, %v707_v17 }
 0x118   : > { %v647_v24 = vsel %vm278_vm0, %v1245_v52, %v999_v19  ;;  %v646_v25 = vsel %vm278_vm0, %v1240_v48, %v998_v20  ;;  %v1012_v26 = vpop.permute.xlu1 %1011  ;;  %v725_v28 = vsel %vm720_vm11, %v715_v23, 0 }
 0x119   : > { %v1007_v27 = vpop.permute.xlu0 %1006  ;;  %925 = vmatpush3.bf16.xpose.msra.mxu0 %v725_v28  ;;  %v1014_v31 = vunpack.i.h.bf16 %v1012_v26  ;;  %v1013_v32 = vunpack.i.l.bf16 %v1012_v26  ;;  %v655_v33 = vsel %vm652_vm4, %v646_v25, %v1003_v22  ;;  %v656_v34 = vsel %vm652_vm4, %v647_v24, %v1004_v21 }
 0x11a   : > { %v1009_v29 = vunpack.i.h.bf16 %v1007_v27  ;;  %v1008_v30 = vunpack.i.l.bf16 %v1007_v27  ;;  %926 = vmatprep.subr.bf16.mxu0 %v1123_v0 }
 0x11c   : > { %v664_v52 = vsel %vm661_vm5, %v655_v33, %v1008_v30  ;;  %v665_v35 = vsel %vm661_vm5, %v656_v34, %v1009_v29  ;;  %v1022_v48 = vpop.permute.xlu1 %1021 }
 0x11d   : > { %v1017_v36 = vpop.permute.xlu0 %1016  ;;  %v1024_v39 = vunpack.i.h.bf16 %v1022_v48  ;;  %v1023_v40 = vunpack.i.l.bf16 %v1022_v48  ;;  %v673_v41 = vsel %vm670_vm6, %v664_v52, %v1013_v32  ;;  %v674_v42 = vsel %vm670_vm6, %v665_v35, %v1014_v31 }
 0x11e   : > { %v1019_v37 = vunpack.i.h.bf16 %v1017_v36  ;;  %v1018_v38 = vunpack.i.l.bf16 %v1017_v36 }
 0x120   : > { %v682_v43 = vsel %vm679_vm7, %v673_v41, %v1018_v38  ;;  %v683_v44 = vsel %vm679_vm7, %v674_v42, %v1019_v37  ;;  %v1032_v45 = vpop.permute.xlu1 %1031 }
 0x121   : > { %v1027_v46 = vpop.permute.xlu0 %1026  ;;  %v1034_v49 = vunpack.i.h.bf16 %v1032_v45  ;;  %v1033_v50 = vunpack.i.l.bf16 %v1032_v45  ;;  %v691_v54 = vsel %vm688_vm8, %v682_v43, %v1023_v40  ;;  %v692_v47 = vsel %vm688_vm8, %v683_v44, %v1024_v39 }
 0x122   : > { %v1029_v51 = vunpack.i.h.bf16 %v1027_v46  ;;  %v1028_v53 = vunpack.i.l.bf16 %v1027_v46 }
 0x124   : > { %v700_v55 = vsel %vm697_vm9, %v691_v54, %v1028_v53  ;;  %v701_v56 = vsel %vm697_vm9, %v692_v47, %v1029_v51  ;;  %v1042_v57 = vpop.permute.xlu1 %1041 }
 0x125   : > { %v1037_v58 = vpop.permute.xlu0 %1036  ;;  %v709_v59 = vsel %vm706_vm10, %v700_v55, %v1033_v50  ;;  %v710_v60 = vsel %vm706_vm10, %v701_v56, %v1034_v49  ;;  %v1044_v1 = vunpack.i.h.bf16 %v1042_v57  ;;  %v1043_v3 = vunpack.i.l.bf16 %v1042_v57 }
 0x126   : > { %v1039_v62 = vunpack.i.h.bf16 %v1037_v58  ;;  %v1038_v63 = vunpack.i.l.bf16 %v1037_v58  ;;  %v716_v4 = vpack.c.bf16 %v710_v60, %v709_v59 }
 0x128   : > { %v649_v5 = vsel %vm278_vm0, %v1262_v2, %v1039_v62  ;;  %v648_v6 = vsel %vm278_vm0, %v1256_v61, %v1038_v63  ;;  %v1052_v7 = vpop.permute.xlu1 %1051  ;;  %v728_v9 = vsel %vm720_vm11, %v716_v4, 0 }
 0x129   : > { %v1047_v8 = vpop.permute.xlu0 %1046  ;;  %927 = vmatpush3.bf16.xpose.msra.mxu0 %v728_v9  ;;  %v1054_v13 = vunpack.i.h.bf16 %v1052_v7  ;;  %v1053_v15 = vunpack.i.l.bf16 %v1052_v7  ;;  %v657_v16 = vsel %vm652_vm4, %v648_v6, %v1043_v3  ;;  %v658_v17 = vsel %vm652_vm4, %v649_v5, %v1044_v1 }
 0x12a   : > { %v1049_v11 = vunpack.i.h.bf16 %v1047_v8  ;;  %v1048_v12 = vunpack.i.l.bf16 %v1047_v8  ;;  %928 = vmatprep.subr.bf16.mxu0 %v1123_v0 }
 0x12c   : > { %v666_v2 = vsel %vm661_vm5, %v657_v16, %v1048_v12  ;;  %v667_v18 = vsel %vm661_vm5, %v658_v17, %v1049_v11  ;;  %v1062_v61 = vpop.permute.xlu1 %1061 }
 0x12d   : > { %v1057_v19 = vpop.permute.xlu0 %1056  ;;  %v1064_v22 = vunpack.i.h.bf16 %v1062_v61  ;;  %v1063_v23 = vunpack.i.l.bf16 %v1062_v61  ;;  %v675_v24 = vsel %vm670_vm6, %v666_v2, %v1053_v15  ;;  %v676_v25 = vsel %vm670_vm6, %v667_v18, %v1054_v13 }
 0x12e   : > { %v1059_v20 = vunpack.i.h.bf16 %v1057_v19  ;;  %v1058_v21 = vunpack.i.l.bf16 %v1057_v19 }
 0x130   : > { %v684_v26 = vsel %vm679_vm7, %v675_v24, %v1058_v21  ;;  %v685_v27 = vsel %vm679_vm7, %v676_v25, %v1059_v20  ;;  %v1072_v28 = vpop.permute.xlu1 %1071  ;;  %v719_v20 = vld [vmem:[%s1396_s1] sm:$0xf] }
 0x131   : > { %v1067_v29 = vpop.permute.xlu0 %1066  ;;  %v1074_v30 = vunpack.i.h.bf16 %v1072_v28  ;;  %v1073_v31 = vunpack.i.l.bf16 %v1072_v28  ;;  %v693_v34 = vsel %vm688_vm8, %v684_v26, %v1063_v23  ;;  %v694_v52 = vsel %vm688_vm8, %v685_v27, %v1064_v22 }
 0x132   : > { %v1069_v32 = vunpack.i.h.bf16 %v1067_v29  ;;  %v1068_v33 = vunpack.i.l.bf16 %v1067_v29  ;;  %v784_v29 = vlaneseq }
 0x134   : > { %v702_v35 = vsel %vm697_vm9, %v693_v34, %v1068_v33  ;;  %v703_v48 = vsel %vm697_vm9, %v694_v52, %v1069_v32  ;;  %v1082_v36 = vpop.permute.xlu1 %1081 }
 0x135   : > { %v1077_v37 = vpop.permute.xlu0 %1076  ;;  %v711_v38 = vsel %vm706_vm10, %v702_v35, %v1073_v31  ;;  %v712_v39 = vsel %vm706_vm10, %v703_v48, %v1074_v30  ;;  %v1084_v42 = vunpack.i.h.bf16 %v1082_v36  ;;  %v1083_v43 = vunpack.i.l.bf16 %v1082_v36 }
 0x136   : > { %v1079_v40 = vunpack.i.h.bf16 %v1077_v37  ;;  %v1078_v41 = vunpack.i.l.bf16 %v1077_v37  ;;  %v717_v44 = vpack.c.bf16 %v712_v39, %v711_v38  ;;  %v785_v30 = vand.u32 127, %v784_v29 }
 0x137   : > { %v787_v31 = vshrl.u32 %v784_v29, 7 }
 0x138   : > { %v651_v45 = vsel %vm278_vm0, %v1278_v14, %v1079_v40  ;;  %v650_v46 = vsel %vm278_vm0, %v1272_v10, %v1078_v41  ;;  %v1092_v49 = vpop.permute.xlu1 %1091  ;;  %v731_v51 = vsel %vm720_vm11, %v717_v44, 0 }
 0x139   : > { %v1087_v50 = vpop.permute.xlu0 %1086  ;;  %929 = vmatpush3.bf16.xpose.msra.mxu0 %v731_v51  ;;  %v1094_v47 = vunpack.i.h.bf16 %v1092_v49  ;;  %v1093_v55 = vunpack.i.l.bf16 %v1092_v49  ;;  %v659_v56 = vsel %vm652_vm4, %v650_v46, %v1083_v43  ;;  %v660_v57 = vsel %vm652_vm4, %v651_v45, %v1084_v42 }
 0x13a   : > { %v1089_v53 = vunpack.i.h.bf16 %v1087_v50  ;;  %v1088_v54 = vunpack.i.l.bf16 %v1087_v50  ;;  %930 = vmatprep.subr.bf16.mxu0 %v1123_v0  ;;  %v788_v32 = vsub.s32 %v785_v30, %v787_v31 }
 0x13c   : > { %v668_v14 = vsel %vm661_vm5, %v659_v56, %v1088_v54  ;;  %v669_v58 = vsel %vm661_vm5, %v660_v57, %v1089_v53  ;;  %v1102_v10 = vpop.permute.xlu1 %1101 }
 0x13d   : > { %v1097_v59 = vpop.permute.xlu0 %1096  ;;  %v1104_v63 = vunpack.i.h.bf16 %v1102_v10  ;;  %v1103_v1 = vunpack.i.l.bf16 %v1102_v10  ;;  %v677_v3 = vsel %vm670_vm6, %v668_v14, %v1093_v55  ;;  %v678_v4 = vsel %vm670_vm6, %v669_v58, %v1094_v47 }
 0x13e   : > { %v1099_v60 = vunpack.i.h.bf16 %v1097_v59  ;;  %v1098_v62 = vunpack.i.l.bf16 %v1097_v59 }
 0x140   : > { %v686_v5 = vsel %vm679_vm7, %v677_v3, %v1098_v62  ;;  %v687_v6 = vsel %vm679_vm7, %v678_v4, %v1099_v60  ;;  %v1112_v7 = vpop.permute.xlu1 %1111 }
 0x141   : > { %v1107_v0 = vpop.permute.xlu0 %1106  ;;  %v1114_v8 = vunpack.i.h.bf16 %v1112_v7  ;;  %v1113_v9 = vunpack.i.l.bf16 %v1112_v7  ;;  %v695_v13 = vsel %vm688_vm8, %v686_v5, %v1103_v1  ;;  %v696_v15 = vsel %vm688_vm8, %v687_v6, %v1104_v63 }
 0x142   : > { %v1109_v11 = vunpack.i.h.bf16 %v1107_v0  ;;  %v1108_v12 = vunpack.i.l.bf16 %v1107_v0 }
 0x144   : > { %v704_v16 = vsel %vm697_vm9, %v695_v13, %v1108_v12  ;;  %v705_v17 = vsel %vm697_vm9, %v696_v15, %v1109_v11 }
 0x145   : > { %v713_v2 = vsel %vm706_vm10, %v704_v16, %v1113_v9  ;;  %v714_v18 = vsel %vm706_vm10, %v705_v17, %v1114_v8 }
 0x146   : > { %v718_v61 = vpack.c.bf16 %v714_v18, %v713_v2 }
 0x148   : > { %v734_v19 = vsel %vm720_vm11, %v718_v61, 0 }
 0x149   : > { %931 = vmatpush3.bf16.xpose.msra.mxu0 %v734_v19 }
 0x150   : > { %933 = vmatmul.mubr.msk.bf16.vlgmr.msra.gmra.mrb[0].mxu0 %vm720_vm11, %v719_v20 }
 0x223   : > { %v770_v21 = vpop.f32.mrb[0].mxu0 }
 0x224   : > { %v776_v22 = vpack.c.bf16 %v770_v21, %v770_v21  ;;  %v934_v23 = vpop.f32.mrb[1].mxu0  ;;  %v780_v24 = vsel %vm779_vm12, %v770_v21, 0.0  ;;  %v793_v25 = vmul.f32 %v770_v21, %v770_v21 }
 0x225   : > { %781 = vadd.xlane.f32.xlu0 %v780_v24  ;;  %v773_v26 = vpop.f32.mrb[2].mxu0 }
 0x226   : > { %778 = vst.msk [vmem:[%s206_s10] sm:$0xf] %vm777_vm13, %v776_v22  ;;  %v935_v27 = vpop.f32.mrb[3].mxu0  ;;  %v794_v28 = vsel %vm779_vm12, %v793_v25, 0.0 }
 0x227   : > { %795 = vadd.xlane.f32.xlu1 %v794_v28 }
 0x2b2   : > { %v782_v33 = vpop.xlane.xlu0 %781 }
 0x2b3   : > { %v789_v34 = vrot.slane %v782_v33, %v788_v32 }
 0x2b4   : > { %v796_v52 = vpop.xlane.xlu1 %795 }
 0x2b5   : > { %792 = vst.msk [vmem:[%s209_s13] sm:$0x1] %vm791_vm14, %v789_v34  ;;  %v801_v35 = vrot.slane %v796_v52, %v788_v32 }
 0x2b7   : > { %803 = vst.msk [vmem:[%s212_s18] sm:$0x1] %vm791_vm14, %v801_v35 }
 0x2b8 PF: > { %s15_s15 = sadd.s32 1, %s1121_s15  }
 0x2b9   : > { %p12_p4 = scmp.ge.s32.totalorder %s15_s15, 4  }
 0x2bb   :  { %14 = sbr.rel (!%p12_p4) target bundleno = 1 (0x1), region = 85 }

</bundles_post_ra>
